<compile_context>
chip_gen: v6e
topology: v6e:2x2x1
jax: 0.10.0
libtpu: 0.0.40
codegen_flags: <defaults>
</compile_context>

<pallas_src>
import functools

import jax
import jax.numpy as jnp
from jax.experimental import pallas as pl
from jax.experimental.pallas import tpu as pltpu


# ------------------------------ fused kernel ------------------------------

def tnet3d_fused_kernel(x_ref, w1, b1, w2, b2, w3, b3, w4, b4, w5, b5, w6, b6,
                        out_ref, maxacc, *, n_points, n_padded):
    """Grid = (batch, point_tiles); point tiles are the reduction axis.

    x_ref: (1, tn, C) bf16.  w*: bf16 (BN folded), b*: (1, fout) f32.
    out_ref: (1, 1, 9) f32, written on the last point tile only.
    maxacc: (8, 1024) f32 running channel max of the raw layer-3 output.
    """
    t = pl.program_id(1)
    last = pl.num_programs(1) - 1
    tn = x_ref.shape[1]

    @pl.when(t == 0)
    def _():
        maxacc[...] = jnp.full_like(maxacc, -jnp.inf)

    x = x_ref[0]  # (tn, C) bf16

    # Point-wise MLP (conv1/conv2/conv3, k=1; BN folded into w/b).
    # bf16 MXU inputs, f32 accumulation.  Layer-3 bias/ReLU hoisted to epilogue.
    h = jnp.dot(x, w1[...], preferred_element_type=jnp.float32) + b1[...]
    h = jnp.maximum(h, 0.0)
    h = jnp.dot(h.astype(jnp.bfloat16), w2[...],
                preferred_element_type=jnp.float32) + b2[...]
    h = jnp.maximum(h, 0.0)
    h3 = jnp.dot(h.astype(jnp.bfloat16), w3[...],
                 preferred_element_type=jnp.float32)           # (tn, 1024) raw

    def fold(v):
        # Fold (tn, 1024) into the (8, 1024) accumulator with elementwise
        # (VPU) maxes; the cross-sublane reduce happens once, in the epilogue.
        maxacc[...] = jnp.maximum(
            maxacc[...], jnp.max(v.reshape(tn // 8, 8, v.shape[-1]), axis=0))

    if n_padded == n_points:  # static: no padding anywhere
        fold(h3)
    else:
        # Only the final tile can contain padded rows -> mask only there.
        @pl.when(t < last)
        def _():
            fold(h3)

        @pl.when(t == last)
        def _():
            row = jax.lax.broadcasted_iota(jnp.int32, (tn, 1), 0) + t * tn
            fold(jnp.where(row < n_points, h3, -jnp.inf))

    # Epilogue on the last tile: finish max-pool, apply the hoisted layer-3
    # bias/ReLU, then run the FC head (fc1/fc2/fc3; eye(3) folded into b6).
    @pl.when(t == last)
    def _():
        pooled = jnp.max(maxacc[...], axis=0, keepdims=True)        # (1, 1024)
        f = jnp.maximum(pooled + b3[...], 0.0)
        h4 = jnp.dot(f.astype(jnp.bfloat16), w4[...],
                     preferred_element_type=jnp.float32) + b4[...]
        h4 = jnp.maximum(h4, 0.0)
        h5 = jnp.dot(h4.astype(jnp.bfloat16), w5[...],
                     preferred_element_type=jnp.float32) + b5[...]
        h5 = jnp.maximum(h5, 0.0)
        out_ref[0] = jnp.dot(h5.astype(jnp.bfloat16), w6[...],
                             preferred_element_type=jnp.float32) + b6[...]


# ------------------------------- wrapper ----------------------------------

def _round_up(v, m):
    return (v + m - 1) // m * m


def _const_spec(arr):
    """Full-array BlockSpec with a constant (all-zeros) block index."""
    zeros = (0,) * arr.ndim
    return pl.BlockSpec(arr.shape, lambda b, t, _z=zeros: _z)


@functools.partial(jax.jit, static_argnames=("tn",))
def tnet3d_forward(x_bcn, params, *, tn=2048):
    """x_bcn: (B, C, N) float32 (PyTorch NCW layout). Returns (B, 3, 3) f32."""
    B, C, N = x_bcn.shape
    w1, b1, w2, b2, w3, b3, w4, b4, w5, b5, w6, b6 = params

    bf = jnp.bfloat16
    w1b, w2b, w3b = w1.astype(bf), w2.astype(bf), w3.astype(bf)
    w4b, w5b, w6b = w4.astype(bf), w5.astype(bf), w6.astype(bf)

    # Point-tile size: multiple of 16 (bf16 sublane packing), clamped to N.
    tn = _round_up(min(tn, N), 16)
    n_pad = _round_up(N, tn)

    # Single fused pass over x: transpose to (B, N, C) (channels on lanes),
    # cast to bf16, pad N up to a tile multiple.  (Fused under jit.)
    x = jnp.transpose(x_bcn, (0, 2, 1)).astype(bf)
    if n_pad != N:
        x = jnp.pad(x, ((0, 0), (0, n_pad - N), (0, 0)))

    kernel = functools.partial(tnet3d_fused_kernel, n_points=N, n_padded=n_pad)

    out = pl.pallas_call(
        kernel,
        out_shape=jax.ShapeDtypeStruct((B, 1, 9), jnp.float32),
        grid_spec=pltpu.PrefetchScalarGridSpec(
            num_scalar_prefetch=0,
            grid=(B, n_pad // tn),
            in_specs=[
                pl.BlockSpec((1, tn, C), lambda b, t: (b, t, 0)),
                _const_spec(w1b), _const_spec(b1),
                _const_spec(w2b), _const_spec(b2),
                _const_spec(w3b), _const_spec(b3),
                _const_spec(w4b), _const_spec(b4),
                _const_spec(w5b), _const_spec(b5),
                _const_spec(w6b), _const_spec(b6),
            ],
            out_specs=pl.BlockSpec((1, 1, 9), lambda b, t: (b, 0, 0)),
            scratch_shapes=[pltpu.VMEM((8, 1024), jnp.float32)],
        ),
        compiler_params=pltpu.CompilerParams(
            dimension_semantics=("parallel", "arbitrary"),
            # tn=2048 keeps ~14-24 MB live (layer-3 f32 intermediates + weights);
            # raise the scoped-VMEM limit so this also fits v5e's 16 MiB default
            # while staying well under v7x's 64 MiB physical VMEM per core.
            vmem_limit_bytes=48 * 1024 * 1024),
    )(x, w1b, b1, w2b, b2, w3b, b3, w4b, b4, w5b, b5, w6b, b6)

    return out.reshape(B, 3, 3)


# ------------------------- parameter construction -------------------------

def _fold_bn(w, b, gamma, beta, mean, var, eps=1e-5):
    """Fold eval-mode BatchNorm into the preceding matmul. w: (in, out)."""
    a = gamma / jnp.sqrt(var + eps)
    w_eff = w * a[None, :]
    b_eff = a * b + beta - a * mean
    return w_eff.astype(jnp.float32), b_eff[None, :].astype(jnp.float32)


def init_params(key, channel=3):
    dims = [(channel, 64), (64, 128), (128, 1024),
            (1024, 512), (512, 256), (256, 9)]
    params = []
    keys = jax.random.split(key, 6 * 6)
    ki = iter(keys)
    for li, (fin, fout) in enumerate(dims):
        w = jax.random.normal(next(ki), (fin, fout), jnp.float32) / jnp.sqrt(fin)
        b = 0.01 * jax.random.normal(next(ki), (fout,), jnp.float32)
        if li < 5:  # layers followed by BatchNorm1d
            gamma = 1.0 + 0.1 * jax.random.normal(next(ki), (fout,), jnp.float32)
            beta = 0.05 * jax.random.normal(next(ki), (fout,), jnp.float32)
            mean = 0.1 * jax.random.normal(next(ki), (fout,), jnp.float32)
            var = 0.5 + jax.random.uniform(next(ki), (fout,), jnp.float32)
            w_eff, b_eff = _fold_bn(w, b, gamma, beta, mean, var)
        else:  # fc3: no BN, add flattened eye(3) to the bias
            _ = next(ki); _ = next(ki); _ = next(ki); _ = next(ki)
            w_eff = w.astype(jnp.float32)
            b_eff = (b + jnp.eye(3, dtype=jnp.float32).flatten())[None, :]
        params += [w_eff, b_eff]
    return tuple(params)


# ------------------------------- reference --------------------------------

def tnet3d_ref(x_bcn, params, compute_dtype=jnp.float32):
    """Pure-JAX reference. compute_dtype=bf16 mirrors the kernel's matmul
    precision (f32 accumulation); compute_dtype=f32 is the exact semantics."""
    w1, b1, w2, b2, w3, b3, w4, b4, w5, b5, w6, b6 = params
    ws = [w.astype(compute_dtype) for w in (w1, w2, w3, w4, w5, w6)]
    w1c, w2c, w3c, w4c, w5c, w6c = ws

    def lin(h, w, b):
        return jnp.dot(h.astype(compute_dtype), w,
                       preferred_element_type=jnp.float32) + b

    x = jnp.transpose(x_bcn, (0, 2, 1))           # (B, N, C)
    h = jax.nn.relu(lin(x, w1c, b1))
    h = jax.nn.relu(lin(h, w2c, b2))
    h = jax.nn.relu(lin(h, w3c, b3))
    f = jnp.max(h, axis=1)                        # (B, 1024)
    f = jax.nn.relu(lin(f, w4c, b4))
    f = jax.nn.relu(lin(f, w5c, b5))
    f = lin(f, w6c, b6)
    return f.reshape(-1, 3, 3)


if __name__ == "__main__":
    key = jax.random.PRNGKey(0)
    k_param, k_x1, k_x2 = jax.random.split(key, 3)

    params = init_params(k_param, channel=3)

    # Case 1: small shapes, single point tile (B=2, C=3, N=64 -> tn=64).
    x1 = jax.random.normal(k_x1, (2, 3, 64), jnp.float32)
    out1 = jax.block_until_ready(tnet3d_forward(x1, params))
    assert out1.shape == (2, 3, 3)
    ref1_bf = tnet3d_ref(x1, params, compute_dtype=jnp.bfloat16)
    ref1_f32 = tnet3d_ref(x1, params, compute_dtype=jnp.float32)
    assert jnp.allclose(out1, ref1_bf, atol=1e-2, rtol=1e-2), "mismatch (bf16-matched ref)"
    assert jnp.allclose(out1, ref1_f32, atol=3e-1, rtol=1e-1), "mismatch (f32 ref)"

    # Case 2: multiple point tiles + padding/mask path (N=200, tn=128 -> pad 256).
    x2 = jax.random.normal(k_x2, (2, 3, 200), jnp.float32)
    out2 = jax.block_until_ready(tnet3d_forward(x2, params, tn=128))
    assert out2.shape == (2, 3, 3)
    ref2_bf = tnet3d_ref(x2, params, compute_dtype=jnp.bfloat16)
    ref2_f32 = tnet3d_ref(x2, params, compute_dtype=jnp.float32)
    assert jnp.allclose(out2, ref2_bf, atol=1e-2, rtol=1e-2), "mismatch (bf16-matched ref)"
    assert jnp.allclose(out2, ref2_f32, atol=3e-1, rtol=1e-1), "mismatch (f32 ref)"

    # Case 3: single point tile covering all of N with padding (N=200, tn=2048 default).
    out3 = jax.block_until_ready(tnet3d_forward(x2, params))
    assert out3.shape == (2, 3, 3)
    assert jnp.allclose(out3, ref2_bf, atol=1e-2, rtol=1e-2), "mismatch (bf16-matched ref, default tn)"

    print("KERNEL_OK")
</pallas_src>

<mosaic_0001>
module attributes {stable_mosaic.version = 11 : i64} {
  func.func @tnet3d_fused_kernel(%arg0: i32, %arg1: i32, %arg2: memref<1x64x3xbf16, #tpu.memory_space<vmem>>, %arg3: memref<3x64xbf16, #tpu.memory_space<vmem>>, %arg4: memref<1x64xf32, #tpu.memory_space<vmem>>, %arg5: memref<64x128xbf16, #tpu.memory_space<vmem>>, %arg6: memref<1x128xf32, #tpu.memory_space<vmem>>, %arg7: memref<128x1024xbf16, #tpu.memory_space<vmem>>, %arg8: memref<1x1024xf32, #tpu.memory_space<vmem>>, %arg9: memref<1024x512xbf16, #tpu.memory_space<vmem>>, %arg10: memref<1x512xf32, #tpu.memory_space<vmem>>, %arg11: memref<512x256xbf16, #tpu.memory_space<vmem>>, %arg12: memref<1x256xf32, #tpu.memory_space<vmem>>, %arg13: memref<256x9xbf16, #tpu.memory_space<vmem>>, %arg14: memref<1x9xf32, #tpu.memory_space<vmem>>, %arg15: memref<1x1x9xf32, #tpu.memory_space<vmem>>, %arg16: memref<8x1024xf32, #tpu.memory_space<vmem>>) attributes {dimension_semantics = [#tpu.dimension_semantics<parallel>, #tpu.dimension_semantics<arbitrary>], iteration_bounds = array<i64: 2, 1>, scalar_prefetch = 0 : i64, scratch_operands = 1 : i64, tpu.core_type = #tpu.core_type<tc>, window_params = [{transform_indices = @transform_0, window_bounds = array<i64: 1, 64, 3>}, {pipeline_mode = #tpu.pipeline_mode<synchronous>, transform_indices = @transform_1, window_bounds = array<i64: 3, 64>}, {pipeline_mode = #tpu.pipeline_mode<synchronous>, transform_indices = @transform_2, window_bounds = array<i64: 1, 64>}, {pipeline_mode = #tpu.pipeline_mode<synchronous>, transform_indices = @transform_3, window_bounds = array<i64: 64, 128>}, {pipeline_mode = #tpu.pipeline_mode<synchronous>, transform_indices = @transform_4, window_bounds = array<i64: 1, 128>}, {pipeline_mode = #tpu.pipeline_mode<synchronous>, transform_indices = @transform_5, window_bounds = array<i64: 128, 1024>}, {pipeline_mode = #tpu.pipeline_mode<synchronous>, transform_indices = @transform_6, window_bounds = array<i64: 1, 1024>}, {pipeline_mode = #tpu.pipeline_mode<synchronous>, transform_indices = @transform_7, window_bounds = array<i64: 1024, 512>}, {pipeline_mode = #tpu.pipeline_mode<synchronous>, transform_indices = @transform_8, window_bounds = array<i64: 1, 512>}, {pipeline_mode = #tpu.pipeline_mode<synchronous>, transform_indices = @transform_9, window_bounds = array<i64: 512, 256>}, {pipeline_mode = #tpu.pipeline_mode<synchronous>, transform_indices = @transform_10, window_bounds = array<i64: 1, 256>}, {pipeline_mode = #tpu.pipeline_mode<synchronous>, transform_indices = @transform_11, window_bounds = array<i64: 256, 9>}, {pipeline_mode = #tpu.pipeline_mode<synchronous>, transform_indices = @transform_12, window_bounds = array<i64: 1, 9>}, {transform_indices = @transform_13, window_bounds = array<i64: 1, 1, 9>}]} {
    %c0_i32 = arith.constant 0 : i32
    %0 = arith.cmpi eq, %arg1, %c0_i32 : i32
    %1 = arith.extui %0 : i1 to i32
    %c0_i32_0 = arith.constant 0 : i32
    %2 = arith.cmpi ne, %1, %c0_i32_0 : i32
    scf.if %2 {
      %cst_24 = arith.constant 0xFF800000 : f32
      %31 = vector.broadcast %cst_24 : f32 to vector<8x1024xf32>
      %c0_25 = arith.constant 0 : index
      %c0_26 = arith.constant 0 : index
      %32 = vector.load %arg16[%c0_25, %c0_26] : memref<8x1024xf32, #tpu.memory_space<vmem>>, vector<8x1024xf32>
      tpu.vector_store %arg16[%c0_25, %c0_26], %31 {strides = array<i32>} : memref<8x1024xf32, #tpu.memory_space<vmem>>, vector<8x1024xf32>,
    } else {
    }
    %c0 = arith.constant 0 : index
    %c0_1 = arith.constant 0 : index
    %c0_2 = arith.constant 0 : index
    %3 = vector.load %arg2[%c0, %c0_1, %c0_2] : memref<1x64x3xbf16, #tpu.memory_space<vmem>>, vector<1x64x3xbf16>
    %4 = vector.shape_cast %3 : vector<1x64x3xbf16> to vector<64x3xbf16>
    %c0_3 = arith.constant 0 : index
    %c0_4 = arith.constant 0 : index
    %5 = vector.load %arg3[%c0_3, %c0_4] : memref<3x64xbf16, #tpu.memory_space<vmem>>, vector<3x64xbf16>
    %cst = arith.constant dense<0.000000e+00> : vector<64x64xf32>
    %6 = tpu.matmul %4, %5, %cst {dimension_numbers = #tpu.dot_dimension_numbers<[1], [0], [0], [1], [0, 0, 1, 1], [], []>} : vector<64x3xbf16>, vector<3x64xbf16>, vector<64x64xf32> -> vector<64x64xf32>
    %c0_5 = arith.constant 0 : index
    %c0_6 = arith.constant 0 : index
    %7 = vector.load %arg4[%c0_5, %c0_6] : memref<1x64xf32, #tpu.memory_space<vmem>>, vector<1x64xf32>
    %8 = vector.broadcast %7 : vector<1x64xf32> to vector<64x64xf32>
    %9 = arith.addf %6, %8 : vector<64x64xf32>
    %cst_7 = arith.constant 0.000000e+00 : f32
    %10 = vector.broadcast %cst_7 : f32 to vector<64x64xf32>
    %11 = arith.maximumf %9, %10 : vector<64x64xf32>
    %12 = arith.truncf %11 : vector<64x64xf32> to vector<64x64xbf16>
    %c0_8 = arith.constant 0 : index
    %c0_9 = arith.constant 0 : index
    %13 = vector.load %arg5[%c0_8, %c0_9] : memref<64x128xbf16, #tpu.memory_space<vmem>>, vector<64x128xbf16>
    %cst_10 = arith.constant dense<0.000000e+00> : vector<64x128xf32>
    %14 = tpu.matmul %12, %13, %cst_10 {dimension_numbers = #tpu.dot_dimension_numbers<[1], [0], [0], [1], [0, 0, 1, 1], [], []>} : vector<64x64xbf16>, vector<64x128xbf16>, vector<64x128xf32> -> vector<64x128xf32>
    %c0_11 = arith.constant 0 : index
    %c0_12 = arith.constant 0 : index
    %15 = vector.load %arg6[%c0_11, %c0_12] : memref<1x128xf32, #tpu.memory_space<vmem>>, vector<1x128xf32>
    %16 = vector.broadcast %15 : vector<1x128xf32> to vector<64x128xf32>
    %17 = arith.addf %14, %16 : vector<64x128xf32>
    %cst_13 = arith.constant 0.000000e+00 : f32
    %18 = vector.broadcast %cst_13 : f32 to vector<64x128xf32>
    %19 = arith.maximumf %17, %18 : vector<64x128xf32>
    %20 = arith.truncf %19 : vector<64x128xf32> to vector<64x128xbf16>
    %c0_14 = arith.constant 0 : index
    %c0_15 = arith.constant 0 : index
    %21 = vector.load %arg7[%c0_14, %c0_15] : memref<128x1024xbf16, #tpu.memory_space<vmem>>, vector<128x1024xbf16>
    %cst_16 = arith.constant dense<0.000000e+00> : vector<64x1024xf32>
    %22 = tpu.matmul %20, %21, %cst_16 {dimension_numbers = #tpu.dot_dimension_numbers<[1], [0], [0], [1], [0, 0, 1, 1], [], []>} : vector<64x128xbf16>, vector<128x1024xbf16>, vector<64x1024xf32> -> vector<64x1024xf32>
    %c0_17 = arith.constant 0 : index
    %c0_18 = arith.constant 0 : index
    %23 = vector.load %arg16[%c0_17, %c0_18] : memref<8x1024xf32, #tpu.memory_space<vmem>>, vector<8x1024xf32>
    %24 = vector.shape_cast %22 : vector<64x1024xf32> to vector<8x8x1024xf32>
    %cst_19 = arith.constant dense<0xFF800000> : vector<8x1024xf32>
    %25 = vector.multi_reduction <maximumf>, %24, %cst_19 [0] : vector<8x8x1024xf32> to vector<8x1024xf32>
    %26 = arith.maximumf %23, %25 : vector<8x1024xf32>
    %c0_20 = arith.constant 0 : index
    %c0_21 = arith.constant 0 : index
    %27 = vector.load %arg16[%c0_20, %c0_21] : memref<8x1024xf32, #tpu.memory_space<vmem>>, vector<8x1024xf32>
    tpu.vector_store %arg16[%c0_20, %c0_21], %26 {strides = array<i32>} : memref<8x1024xf32, #tpu.memory_space<vmem>>, vector<8x1024xf32>,
    %c0_i32_22 = arith.constant 0 : i32
    %28 = arith.cmpi eq, %arg1, %c0_i32_22 : i32
    %29 = arith.extui %28 : i1 to i32
    %c0_i32_23 = arith.constant 0 : i32
    %30 = arith.cmpi ne, %29, %c0_i32_23 : i32
    scf.if %30 {
      %c0_24 = arith.constant 0 : index
      %c0_25 = arith.constant 0 : index
      %31 = vector.load %arg16[%c0_24, %c0_25] : memref<8x1024xf32, #tpu.memory_space<vmem>>, vector<8x1024xf32>
      %cst_26 = arith.constant dense<0xFF800000> : vector<1024xf32>
      %32 = vector.multi_reduction <maximumf>, %31, %cst_26 [0] : vector<8x1024xf32> to vector<1024xf32>
      %33 = vector.shape_cast %32 : vector<1024xf32> to vector<1x1024xf32>
      %c0_27 = arith.constant 0 : index
      %c0_28 = arith.constant 0 : index
      %34 = vector.load %arg8[%c0_27, %c0_28] : memref<1x1024xf32, #tpu.memory_space<vmem>>, vector<1x1024xf32>
      %35 = arith.addf %33, %34 : vector<1x1024xf32>
      %cst_29 = arith.constant 0.000000e+00 : f32
      %36 = vector.broadcast %cst_29 : f32 to vector<1x1024xf32>
      %37 = arith.maximumf %35, %36 : vector<1x1024xf32>
      %38 = arith.truncf %37 : vector<1x1024xf32> to vector<1x1024xbf16>
      %c0_30 = arith.constant 0 : index
      %c0_31 = arith.constant 0 : index
      %39 = vector.load %arg9[%c0_30, %c0_31] : memref<1024x512xbf16, #tpu.memory_space<vmem>>, vector<1024x512xbf16>
      %cst_32 = arith.constant dense<0.000000e+00> : vector<1x512xf32>
      %40 = tpu.matmul %38, %39, %cst_32 {dimension_numbers = #tpu.dot_dimension_numbers<[1], [0], [0], [1], [0, 0, 1, 1], [], []>} : vector<1x1024xbf16>, vector<1024x512xbf16>, vector<1x512xf32> -> vector<1x512xf32>
      %c0_33 = arith.constant 0 : index
      %c0_34 = arith.constant 0 : index
      %41 = vector.load %arg10[%c0_33, %c0_34] : memref<1x512xf32, #tpu.memory_space<vmem>>, vector<1x512xf32>
      %42 = arith.addf %40, %41 : vector<1x512xf32>
      %cst_35 = arith.constant 0.000000e+00 : f32
      %43 = vector.broadcast %cst_35 : f32 to vector<1x512xf32>
      %44 = arith.maximumf %42, %43 : vector<1x512xf32>
      %45 = arith.truncf %44 : vector<1x512xf32> to vector<1x512xbf16>
      %c0_36 = arith.constant 0 : index
      %c0_37 = arith.constant 0 : index
      %46 = vector.load %arg11[%c0_36, %c0_37] : memref<512x256xbf16, #tpu.memory_space<vmem>>, vector<512x256xbf16>
      %cst_38 = arith.constant dense<0.000000e+00> : vector<1x256xf32>
      %47 = tpu.matmul %45, %46, %cst_38 {dimension_numbers = #tpu.dot_dimension_numbers<[1], [0], [0], [1], [0, 0, 1, 1], [], []>} : vector<1x512xbf16>, vector<512x256xbf16>, vector<1x256xf32> -> vector<1x256xf32>
      %c0_39 = arith.constant 0 : index
      %c0_40 = arith.constant 0 : index
      %48 = vector.load %arg12[%c0_39, %c0_40] : memref<1x256xf32, #tpu.memory_space<vmem>>, vector<1x256xf32>
      %49 = arith.addf %47, %48 : vector<1x256xf32>
      %cst_41 = arith.constant 0.000000e+00 : f32
      %50 = vector.broadcast %cst_41 : f32 to vector<1x256xf32>
      %51 = arith.maximumf %49, %50 : vector<1x256xf32>
      %52 = arith.truncf %51 : vector<1x256xf32> to vector<1x256xbf16>
      %c0_42 = arith.constant 0 : index
      %c0_43 = arith.constant 0 : index
      %53 = vector.load %arg13[%c0_42, %c0_43] : memref<256x9xbf16, #tpu.memory_space<vmem>>, vector<256x9xbf16>
      %cst_44 = arith.constant dense<0.000000e+00> : vector<1x9xf32>
      %54 = tpu.matmul %52, %53, %cst_44 {dimension_numbers = #tpu.dot_dimension_numbers<[1], [0], [0], [1], [0, 0, 1, 1], [], []>} : vector<1x256xbf16>, vector<256x9xbf16>, vector<1x9xf32> -> vector<1x9xf32>
      %c0_45 = arith.constant 0 : index
      %c0_46 = arith.constant 0 : index
      %55 = vector.load %arg14[%c0_45, %c0_46] : memref<1x9xf32, #tpu.memory_space<vmem>>, vector<1x9xf32>
      %56 = arith.addf %54, %55 : vector<1x9xf32>
      %c0_47 = arith.constant 0 : index
      %c0_48 = arith.constant 0 : index
      %c0_49 = arith.constant 0 : index
      %57 = vector.load %arg15[%c0_47, %c0_48, %c0_49] : memref<1x1x9xf32, #tpu.memory_space<vmem>>, vector<1x1x9xf32>
      %58 = vector.shape_cast %57 : vector<1x1x9xf32> to vector<1x9xf32>
      %59 = vector.shape_cast %56 : vector<1x9xf32> to vector<1x1x9xf32>
      tpu.vector_store %arg15[%c0_47, %c0_48, %c0_49], %59 {strides = array<i32>} : memref<1x1x9xf32, #tpu.memory_space<vmem>>, vector<1x1x9xf32>,
    } else {
    }
    return
  }
  func.func @transform_0(%arg0: i32, %arg1: i32) -> (i32, i32, i32) {
    %c0_i32 = arith.constant 0 : i32
    %c0_i32_0 = arith.constant 0 : i32
    return %arg0, %arg1, %c0_i32 : i32, i32, i32
  }
  func.func @transform_1(%arg0: i32, %arg1: i32) -> (i32, i32) {
    %c0_i32 = arith.constant 0 : i32
    %c0_i32_0 = arith.constant 0 : i32
    %c0_i32_1 = arith.constant 0 : i32
    return %c0_i32, %c0_i32_0 : i32, i32
  }
  func.func @transform_2(%arg0: i32, %arg1: i32) -> (i32, i32) {
    %c0_i32 = arith.constant 0 : i32
    %c0_i32_0 = arith.constant 0 : i32
    %c0_i32_1 = arith.constant 0 : i32
    return %c0_i32, %c0_i32_0 : i32, i32
  }
  func.func @transform_3(%arg0: i32, %arg1: i32) -> (i32, i32) {
    %c0_i32 = arith.constant 0 : i32
    %c0_i32_0 = arith.constant 0 : i32
    %c0_i32_1 = arith.constant 0 : i32
    return %c0_i32, %c0_i32_0 : i32, i32
  }
  func.func @transform_4(%arg0: i32, %arg1: i32) -> (i32, i32) {
    %c0_i32 = arith.constant 0 : i32
    %c0_i32_0 = arith.constant 0 : i32
    %c0_i32_1 = arith.constant 0 : i32
    return %c0_i32, %c0_i32_0 : i32, i32
  }
  func.func @transform_5(%arg0: i32, %arg1: i32) -> (i32, i32) {
    %c0_i32 = arith.constant 0 : i32
    %c0_i32_0 = arith.constant 0 : i32
    %c0_i32_1 = arith.constant 0 : i32
    return %c0_i32, %c0_i32_0 : i32, i32
  }
  func.func @transform_6(%arg0: i32, %arg1: i32) -> (i32, i32) {
    %c0_i32 = arith.constant 0 : i32
    %c0_i32_0 = arith.constant 0 : i32
    %c0_i32_1 = arith.constant 0 : i32
    return %c0_i32, %c0_i32_0 : i32, i32
  }
  func.func @transform_7(%arg0: i32, %arg1: i32) -> (i32, i32) {
    %c0_i32 = arith.constant 0 : i32
    %c0_i32_0 = arith.constant 0 : i32
    %c0_i32_1 = arith.constant 0 : i32
    return %c0_i32, %c0_i32_0 : i32, i32
  }
  func.func @transform_8(%arg0: i32, %arg1: i32) -> (i32, i32) {
    %c0_i32 = arith.constant 0 : i32
    %c0_i32_0 = arith.constant 0 : i32
    %c0_i32_1 = arith.constant 0 : i32
    return %c0_i32, %c0_i32_0 : i32, i32
  }
  func.func @transform_9(%arg0: i32, %arg1: i32) -> (i32, i32) {
    %c0_i32 = arith.constant 0 : i32
    %c0_i32_0 = arith.constant 0 : i32
    %c0_i32_1 = arith.constant 0 : i32
    return %c0_i32, %c0_i32_0 : i32, i32
  }
  func.func @transform_10(%arg0: i32, %arg1: i32) -> (i32, i32) {
    %c0_i32 = arith.constant 0 : i32
    %c0_i32_0 = arith.constant 0 : i32
    %c0_i32_1 = arith.constant 0 : i32
    return %c0_i32, %c0_i32_0 : i32, i32
  }
  func.func @transform_11(%arg0: i32, %arg1: i32) -> (i32, i32) {
    %c0_i32 = arith.constant 0 : i32
    %c0_i32_0 = arith.constant 0 : i32
    %c0_i32_1 = arith.constant 0 : i32
    return %c0_i32, %c0_i32_0 : i32, i32
  }
  func.func @transform_12(%arg0: i32, %arg1: i32) -> (i32, i32) {
    %c0_i32 = arith.constant 0 : i32
    %c0_i32_0 = arith.constant 0 : i32
    %c0_i32_1 = arith.constant 0 : i32
    return %c0_i32, %c0_i32_0 : i32, i32
  }
  func.func @transform_13(%arg0: i32, %arg1: i32) -> (i32, i32, i32) {
    %c0_i32 = arith.constant 0 : i32
    %c0_i32_0 = arith.constant 0 : i32
    %c0_i32_1 = arith.constant 0 : i32
    return %arg0, %c0_i32, %c0_i32_0 : i32, i32, i32
  }
}

</mosaic_0001>

<bundles_post_ra>
// kernel: tnet3d_forward.1
= control target key start
LH: loop header
LB: loop body
LE: loop exit
PB: predicated region body
PF: predicated region fallthrough
CT: control target
= control target key end

     0   :  { %s5344_s25 = smov 0   ;;  %s5346_s26 = smov 0   ;;  %s6821_s0 = inlined_call_operand.vmem [shape: bf16[2,64,3], index: 0, kind: input, shape index: {}]   ;;  %s6822_s1 = inlined_call_operand.vmem [shape: bf16[3,64], index: 1, kind: input, shape index: {}]   ;;  %s6823_s2 = inlined_call_operand.vmem [shape: f32[1,64], index: 2, kind: input, shape index: {}]   ;;  %s6824_s3 = inlined_call_operand.vmem [shape: bf16[64,128], index: 3, kind: input, shape index: {}]   ;;  %s6825_s4 = inlined_call_operand.vmem [shape: f32[1,128], index: 4, kind: input, shape index: {}]   ;;  %s6826_s5 = inlined_call_operand.vmem [shape: bf16[128,1024], index: 5, kind: input, shape index: {}]   ;;  %s6827_s6 = inlined_call_operand.vmem [shape: f32[1,1024], index: 6, kind: input, shape index: {}]   ;;  %s6828_s7 = inlined_call_operand.vmem [shape: bf16[1024,512], index: 7, kind: input, shape index: {}]   ;;  %s6829_s8 = inlined_call_operand.vmem [shape: f32[1,512], index: 8, kind: input, shape index: {}]   ;;  %s6830_s9 = inlined_call_operand.vmem [shape: bf16[512,256], index: 9, kind: input, shape index: {}]   ;;  %s6831_s10 = inlined_call_operand.vmem [shape: f32[1,256], index: 10, kind: input, shape index: {}]   ;;  %s6832_s11 = inlined_call_operand.vmem [shape: bf16[256,9], index: 11, kind: input, shape index: {}]   ;;  %s6833_s12 = inlined_call_operand.vmem [shape: f32[1,9], index: 12, kind: input, shape index: {}]   ;;  %s6834_s13 = inlined_call_operand.vmem [shape: f32[2,1,9], index: 13, kind: output, shape index: {}]  }
   0x1   :  { %s5348_s27 = smov 0  }
   0x2 LB: > { %s35_s28 = sadd.s32 1, %s5266_s26  ;;  %p4233_p0 = scmp.ge.s32.totalorder %s5270_s27, 1  ;;  %s5270_s27 = sphi %s5348_s27, %s23_s27   ;;  %s5266_s26 = sphi %s5346_s26, %s6836_s26   ;;  %s5262_s25 = sphi %s5344_s25, %s6835_s25  }
   0x3   : > { %p37_p1 = scmp.ge.s32.totalorder %s35_s28, 2  ;;  %p406_p2 = scmp.lt.s32.totalorder %s5270_s27, 3 }
   0x5   : > { %s6838_s28 = smov (%p37_p1, %s35_s28), 0  ;;  %p407_p3 = pnand %p4233_p0, %p406_p2 }
   0x6   : > { %p453_p4 = scmp.lt.s32.totalorder (!%p407_p3), %s5262_s25, 1 }
   0x7   : > { %410 = sbr.rel (%p407_p3) target bundleno = 1474 (0x5c2), region = 72 }
   0xc   : > { %v486_v0 = vld [vmem:[%s6822_s1] sm:$0x3]  ;;  %vm527_vm0 = vcmask 1040384   ;;  %vm528_vm1 = vcmask 1041408   ;;  %v5272_v1 = vmov 65535   ;;  %s6840_s25 = smov (!%p453_p4, %s5262_s25), 1 }
   0xd   : > { %v529_v2 = vsel %vm527_vm0, 4294967295, %v5272_v1  ;;  %v4748_v4 = vld [vmem:[%s6824_s3 + $0x18] sm:$0xff]   ;;  %s4656_s16 = sshll.u32 %s6840_s25, 5  ;;  %vm514_vm2 = vcmask 23552   ;;  %v4749_v10 = vld [vmem:[%s6824_s3 + $0x10] sm:$0xff]   ;;  %v4750_v11 = vld [vmem:[%s6824_s3 + $0x8] sm:$0xff]   ;;  %s464_s21 = scalar_lea.vmem %s6834_s13, %s6840_s25 }
   0xe   : > { %v530_v3 = vsel %vm528_vm1, %v529_v2, 0  ;;  %s460_s19 = scalar_lea.vmem %s6821_s0, %s4656_s16  ;;  %v4751_v12 = vld [vmem:[%s6824_s3] sm:$0xff]   ;;  %v5392_v15 = vld [vmem:[%s6826_s5 + $0x1c8] sm:$0xff]  ;;  %vm650_vm3 = vcmask 523264   ;;  %vm4166_vm4 = vcmask 65536  }
   0xf   : > { %v532_v5 = vand.u32 %v530_v3, %v486_v0  ;;  %v4744_v6 = vld [vmem:[%s460_s19] sm:$0xff]   ;;  %v4745_v7 = vld [vmem:[%s460_s19 + $0x8] sm:$0xff]   ;;  %v4746_v8 = vld [vmem:[%s460_s19 + $0x10] sm:$0xff]  }
  0x10   : > { %4694 = vmatprep.mubr.msk.bf16.mxu1 %vm514_vm2, %v4744_v6  ;;  %v4747_v9 = vld [vmem:[%s460_s19 + $0x18] sm:$0xff]   ;;  %v796_v13 = vld [vmem:[%s6826_s5 + $0x1c0] sm:$0xff]  ;;  %v5397_v17 = vld [vmem:[%s6826_s5 + $0x1e8] sm:$0xff] }
  0x11   : > { %4692 = vmatprep.subr.bf16.mxu1 %v532_v5  ;;  %v800_v14 = vld [vmem:[%s6826_s5 + $0x1e0] sm:$0xff]  ;;  %v4312_v21 = vcombine.low %v5392_v15, %v5397_v17  ;;  %v4313_v22 = vcombine.high %v5392_v15, %v5397_v17  ;;  %v789_v50 = vld [vmem:[%s6826_s5 + $0x188] sm:$0xff] }
  0x12   : > { %4693 = vmatpush3.bf16.msra.mxu1 %v532_v5  ;;  %v4311_v16 = vcombine.high %v796_v13, %v800_v14  ;;  %v4310_v18 = vcombine.low %v796_v13, %v800_v14  ;;  %v788_v19 = vld [vmem:[%s6826_s5 + $0x180] sm:$0xff]  ;;  %v793_v51 = vld [vmem:[%s6826_s5 + $0x1a8] sm:$0xff] }
  0x13   : > { %4702 = vmatprep.subr.bf16.mxu1 %v4748_v4  ;;  %v792_v20 = vld [vmem:[%s6826_s5 + $0x1a0] sm:$0xff]  ;;  %v4305_v59 = vcombine.high %v789_v50, %v793_v51  ;;  %v781_v61 = vld [vmem:[%s6826_s5 + $0x148] sm:$0xff] }
  0x14   : > { %v4303_v23 = vcombine.high %v788_v19, %v792_v20  ;;  %v780_v24 = vld [vmem:[%s6826_s5 + $0x140] sm:$0xff]  ;;  %1124 = vmatprep.subr.bf16.mxu0 %v4311_v16  ;;  %v4302_v26 = vcombine.low %v788_v19, %v792_v20  ;;  %v785_v62 = vld [vmem:[%s6826_s5 + $0x168] sm:$0xff] }
  0x15   : > { %4695 = vmatmul.mubr.msk.bf16.vlgmr.msra.gmra.mxu1 %vm514_vm2, %v4745_v7  ;;  %v784_v25 = vld [vmem:[%s6826_s5 + $0x160] sm:$0xff]  ;;  %1125 = vmatpush1.bf16.msra.mxu0 %v4310_v18  ;;  %v4297_v5 = vcombine.high %v781_v61, %v785_v62  ;;  %v773_v7 = vld [vmem:[%s6826_s5 + $0x108] sm:$0xff] }
  0x16   : > { %4698 = vmatprep.mubr.msk.bf16.mxu1 %vm514_vm2, %v4746_v8  ;;  %4703 = vmatpush3.bf16.msra.mxu1 %v4748_v4  ;;  %v4295_v27 = vcombine.high %v780_v24, %v784_v25  ;;  %v772_v28 = vld [vmem:[%s6826_s5 + $0x100] sm:$0xff]  ;;  %v4294_v30 = vcombine.low %v780_v24, %v784_v25  ;;  %v4304_v4 = vcombine.low %v789_v50, %v793_v51  ;;  %v777_v8 = vld [vmem:[%s6826_s5 + $0x128] sm:$0xff] }
  0x17   : > { %4704 = vmatprep.subr.bf16.mxu1 %v4749_v10  ;;  %1126 = vmatprep.subr.bf16.mxu0 %v4303_v23  ;;  %v776_v29 = vld [vmem:[%s6826_s5 + $0x120] sm:$0xff]  ;;  %v765_v13 = vld [vmem:[%s6826_s5 + $0xc8] sm:$0xff]  ;;  %v4288_v15 = vcombine.low %v773_v7, %v777_v8 }
  0x18   : > { %v764_v31 = vld [vmem:[%s6826_s5 + $0xc0] sm:$0xff]  ;;  %v4287_v33 = vcombine.high %v772_v28, %v776_v29  ;;  %v4286_v34 = vcombine.low %v772_v28, %v776_v29  ;;  %v769_v14 = vld [vmem:[%s6826_s5 + $0xe8] sm:$0xff] }
  0x19   : > { %1127 = vmatpush1.bf16.msra.mxu0 %v4302_v26  ;;  %v768_v32 = vld [vmem:[%s6826_s5 + $0xe0] sm:$0xff]  ;;  %v4281_v16 = vcombine.high %v765_v13, %v769_v14  ;;  %v4280_v17 = vcombine.low %v765_v13, %v769_v14  ;;  %v757_v20 = vld [vmem:[%s6826_s5 + $0x88] sm:$0xff] }
  0x1a   : > { %4705 = vmatpush3.bf16.msra.mxu1 %v4749_v10  ;;  %1128 = vmatprep.subr.bf16.mxu0 %v4295_v27  ;;  %v4279_v35 = vcombine.high %v764_v31, %v768_v32  ;;  %v4278_v36 = vcombine.low %v764_v31, %v768_v32  ;;  %v4236_v39 = vld [vmem:[%s6823_s2] ss:$0 sm:$0xff]  ;;  %v749_v28 = vld [vmem:[%s6826_s5 + $0x48] sm:$0xff] }
  0x1b   : > { %4706 = vmatprep.subr.bf16.mxu1 %v4750_v11  ;;  %v756_v18 = vld [vmem:[%s6826_s5 + $0x80] sm:$0xff] }
  0x1c   : > { %v760_v19 = vld [vmem:[%s6826_s5 + $0xa0] sm:$0xff] }
  0x1d   : > { %4699 = vmatmul.mubr.msk.bf16.gmra.mxu1 %vm514_vm2, %v4747_v9  ;;  %1129 = vmatpush1.bf16.msra.mxu0 %v4294_v30  ;;  %v4270_v25 = vcombine.low %v756_v18, %v760_v19  ;;  %v748_v26 = vld [vmem:[%s6826_s5 + $0x40] sm:$0xff]  ;;  %v753_v30 = vld [vmem:[%s6826_s5 + $0x68] sm:$0xff] }
  0x1e   : > { %4707 = vmatpush3.bf16.msra.mxu1 %v4750_v11  ;;  %1130 = vmatprep.subr.bf16.mxu0 %v4287_v33  ;;  %v4296_v11 = vcombine.low %v781_v61, %v785_v62  ;;  %v752_v27 = vld [vmem:[%s6826_s5 + $0x60] sm:$0xff]  ;;  %v4264_v31 = vcombine.low %v749_v28, %v753_v30  ;;  %v4265_v32 = vcombine.high %v749_v28, %v753_v30  ;;  %v791_v61 = vld [vmem:[%s6826_s5 + $0x198] sm:$0xff]  ;;  %v770_v30 = vld [vmem:[%s6826_s5 + $0xf0] sm:$0xff] }
  0x1f   : > { %4708 = vmatprep.subr.bf16.mxu1 %v4751_v12  ;;  %v4263_v29 = vcombine.high %v748_v26, %v752_v27  ;;  %v4262_v33 = vcombine.low %v748_v26, %v752_v27  ;;  %v795_v62 = vld [vmem:[%s6826_s5 + $0x1b8] sm:$0xff] }
  0x20   : > { %v4308_v13 = vcombine.low %v791_v61, %v795_v62 }
  0x21   : > { %1131 = vmatpush1.bf16.msra.mxu0 %v4286_v34  ;;  %v740_v34 = vld [vmem:[%s6826_s5] sm:$0xff] }
  0x22   : > { %4709 = vmatpush3.bf16.msra.mxu1 %v4751_v12  ;;  %1132 = vmatprep.subr.bf16.mxu0 %v4279_v35  ;;  %v4289_v12 = vcombine.high %v773_v7, %v777_v8  ;;  %v744_v35 = vld [vmem:[%s6826_s5 + $0x20] sm:$0xff]  ;;  %v786_v8 = vld [vmem:[%s6826_s5 + $0x170] sm:$0xff] }
  0x23   : > { %1197 = vmatprep.subr.bf16.mxu1 %v4313_v22  ;;  %v761_v22 = vld [vmem:[%s6826_s5 + $0xa8] sm:$0xff] }
  0x24   : > { %v4272_v23 = vcombine.low %v757_v20, %v761_v22  ;;  %v4273_v24 = vcombine.high %v757_v20, %v761_v22  ;;  %v775_v20 = vld [vmem:[%s6826_s5 + $0x118] sm:$0xff] }
  0x25   : > { %1133 = vmatpush1.bf16.msra.mxu0 %v4278_v36  ;;  %v741_v36 = vld [vmem:[%s6826_s5 + $0x8] sm:$0xff] }
  0xd5   : > { %v4696_v37 = vpop.f32.mrf.mxu1 }
  0xd6   : > { %v577_v43 = vadd.f32 %v4696_v37, %v4236_v39  ;;  %v4255_v37 = vcombine.high %v740_v34, %v744_v35 }
  0xd7   : > { %v568_v38 = vpop.f32.mrf.mxu1 }
  0xd8   : > { %v569_v41 = vadd.f32 %v4236_v39, %v568_v38  ;;  %v601_v52 = vmax.f32 %v577_v43, 0.0  ;;  %v745_v38 = vld [vmem:[%s6826_s5 + $0x28] sm:$0xff]  ;;  %v802_v43 = vld [vmem:[%s6826_s5 + $0x1f0] sm:$0xff] }
  0xd9   : > { %v4697_v40 = vpop.f32.mrf.mxu1 }
  0xda   : > { %v580_v42 = vadd.f32 %v4697_v40, %v4236_v39  ;;  %v599_v48 = vmax.f32 %v569_v41, 0.0  ;;  %v4257_v40 = vcombine.high %v741_v36, %v745_v38  ;;  %v4254_v41 = vcombine.low %v740_v34, %v744_v35 }
  0xdb   : > { %v571_v44 = vpop.f32.mrf.mxu1 }
  0xdc   : > { %v572_v45 = vadd.f32 %v4236_v39, %v571_v44  ;;  %v602_v46 = vmax.f32 %v580_v42, 0.0  ;;  %v798_v42 = vld [vmem:[%s6826_s5 + $0x1d0] sm:$0xff]  ;;  %v799_v44 = vld [vmem:[%s6826_s5 + $0x1d8] sm:$0xff] }
  0xdd   : > { %v4700_v47 = vpop.f32.mrf.mxu1 }
  0xde   : > { %v600_v49 = vmax.f32 %v572_v45, 0.0  ;;  %v593_v53 = vadd.f32 %v4700_v47, %v4236_v39  ;;  %v608_v57 = vpack.c.bf16 %v602_v46, %v601_v52  ;;  %v4315_v45 = vcombine.high %v798_v42, %v802_v43  ;;  %v803_v46 = vld [vmem:[%s6826_s5 + $0x1f8] sm:$0xff] }
  0xdf   : > { %v584_v54 = vpop.f32.mrf.mxu1  ;;  %v5273_v47 = vmov 0   ;;  %v4317_v50 = vcombine.high %v799_v44, %v803_v46 }
  0xe0   : > { %v607_v55 = vpack.c.bf16 %v600_v49, %v599_v48  ;;  %v585_v56 = vadd.f32 %v4236_v39, %v584_v54  ;;  %v605_v63 = vmax.f32 %v593_v53, 0.0  ;;  %1156 = vmatprep.mubr.bf16.mxu0 %v5273_v47  ;;  %v4314_v48 = vcombine.low %v798_v42, %v802_v43  ;;  %v5511_v53 = vld [vmem:[%s6825_s4] ss:$0 sm:$0xff]  ;;  %v763_v42 = vld [vmem:[%s6826_s5 + $0xb8] sm:$0xff] }
  0xe1   : > { %v4701_v58 = vpop.f32.mrf.mxu1  ;;  %v4316_v49 = vcombine.low %v799_v44, %v803_v46 }
  0xe2   : > { %v596_v60 = vadd.f32 %v4701_v58, %v4236_v39  ;;  %4710 = vmatprep.mubr.msk.bf16.mxu1 %vm650_vm3, %v607_v55  ;;  %v603_v1 = vmax.f32 %v585_v56, 0.0  ;;  %v790_v58 = vld [vmem:[%s6826_s5 + $0x190] sm:$0xff] }
  0xe3   : > { %v587_v0 = vpop.f32.mrf.mxu1  ;;  %4711 = vmatmul.mubr.msk.bf16.vlgmr.msra.gmra.mxu1 %vm650_vm3, %v608_v57 }
  0xe4   : > { %v606_v2 = vmax.f32 %v596_v60, 0.0  ;;  %v588_v3 = vadd.f32 %v4236_v39, %v587_v0  ;;  %1198 = vmatpush1.bf16.msra.mxu1 %v4312_v21  ;;  %v4271_v21 = vcombine.high %v756_v18, %v760_v19  ;;  %v4256_v39 = vcombine.low %v741_v36, %v745_v38  ;;  %v794_v60 = vld [vmem:[%s6826_s5 + $0x1b0] sm:$0xff] }
  0xe5   : > { %1199 = vmatprep.subr.bf16.mxu1 %v4305_v59  ;;  %v778_v18 = vld [vmem:[%s6826_s5 + $0x130] sm:$0xff] }
  0xe6   : > { %v604_v6 = vmax.f32 %v588_v3, 0.0  ;;  %v610_v9 = vpack.c.bf16 %v606_v2, %v605_v63  ;;  %1134 = vmatprep.subr.bf16.mxu0 %v4271_v21  ;;  %v779_v21 = vld [vmem:[%s6826_s5 + $0x138] sm:$0xff] }
  0xe7   : > { %1135 = vmatpush1.bf16.msra.mxu0 %v4270_v25  ;;  %v4293_v28 = vcombine.high %v775_v20, %v779_v21  ;;  %v4292_v35 = vcombine.low %v775_v20, %v779_v21  ;;  %v4767_v20 = vld [vmem:[%s6828_s7 + $0x2a0] ss:$16 sps:$4 sm:$0xff]   ;;  %v4772_v21 = vld [vmem:[%s6828_s7 + $0x84] ss:$16 sps:$4 sm:$0xff]  }
  0xe8   : > { %v609_v10 = vpack.c.bf16 %v604_v6, %v603_v1  ;;  %1200 = vmatpush1.bf16.msra.mxu1 %v4304_v4  ;;  %1136 = vmatprep.subr.bf16.mxu0 %v4263_v29  ;;  %v4307_v4 = vcombine.high %v790_v58, %v794_v60  ;;  %v782_v6 = vld [vmem:[%s6826_s5 + $0x150] sm:$0xff] }
  0xe9   : > { %1201 = vmatprep.subr.bf16.mxu1 %v4297_v5  ;;  %v4309_v5 = vcombine.high %v791_v61, %v795_v62  ;;  %v766_v29 = vld [vmem:[%s6826_s5 + $0xd0] sm:$0xff] }
  0xea   : > { %4714 = vmatprep.mubr.msk.bf16.mxu1 %vm650_vm3, %v609_v10  ;;  %v787_v10 = vld [vmem:[%s6826_s5 + $0x178] sm:$0xff]  ;;  %v4282_v44 = vcombine.low %v766_v29, %v770_v30 }
  0xeb   : > { %4715 = vmatmul.mubr.msk.bf16.gmra.mxu1 %vm650_vm3, %v610_v9  ;;  %1137 = vmatpush1.bf16.msra.mxu0 %v4262_v33  ;;  %v783_v9 = vld [vmem:[%s6826_s5 + $0x158] sm:$0xff] }
  0xec   : > { %1202 = vmatpush1.bf16.msra.mxu1 %v4296_v11  ;;  %1138 = vmatprep.subr.bf16.mxu0 %v4255_v37  ;;  %v4283_v37 = vcombine.high %v766_v29, %v770_v30  ;;  %v4787_v29 = vld [vmem:[%s6828_s7 + $0x244] ss:$16 sps:$4 sm:$0xff]   ;;  %v4782_v30 = vld [vmem:[%s6828_s7 + $0x40] ss:$16 sps:$4 sm:$0xff]  }
  0xed   : > { %1203 = vmatprep.subr.bf16.mxu1 %v4289_v12  ;;  %1229 = vmatprep.mubr.bf16.mxu1 %v5273_v47  ;;  %v4306_v12 = vcombine.low %v790_v58, %v794_v60 }
  0xef   : > { %1139 = vmatpush1.bf16.msra.mxu0 %v4254_v41  ;;  %v759_v41 = vld [vmem:[%s6826_s5 + $0x98] sm:$0xff] }
  0xf0   : > { %1204 = vmatpush1.bf16.msra.mxu1 %v4288_v15  ;;  %1270 = vmatprep.subr.bf16.mxu0 %v4315_v45  ;;  %v4299_v15 = vcombine.high %v782_v6, %v786_v8  ;;  %v4276_v58 = vcombine.low %v759_v41, %v763_v42 }
  0xf1   : > { %1205 = vmatprep.subr.bf16.mxu1 %v4281_v16  ;;  %v4301_v16 = vcombine.high %v783_v9, %v787_v10 }
  0xf4   : > { %1206 = vmatpush1.bf16.msra.mxu1 %v4280_v17  ;;  %v774_v17 = vld [vmem:[%s6826_s5 + $0x110] sm:$0xff] }
  0xf5   : > { %1207 = vmatprep.subr.bf16.mxu1 %v4273_v24  ;;  %v4300_v24 = vcombine.low %v783_v9, %v787_v10  ;;  %v4291_v25 = vcombine.high %v774_v17, %v778_v18  ;;  %v4290_v34 = vcombine.low %v774_v17, %v778_v18  ;;  %v4754_v10 = vld [vmem:[%s6828_s7 + $0xe4] ss:$16 sps:$4 sm:$0xff]   ;;  %v4761_v17 = vld [vmem:[%s6828_s7 + $0x2c0] ss:$16 sps:$4 sm:$0xff]  }
  0xf6   : > { %v4769_v18 = vld [vmem:[%s6828_s7 + $0x2a4] ss:$16 sps:$4 sm:$0xff]  }
  0xf8   : > { %1208 = vmatpush1.bf16.msra.mxu1 %v4272_v23  ;;  %v4298_v23 = vcombine.low %v782_v6, %v786_v8 }
  0xf9   : > { %1209 = vmatprep.subr.bf16.mxu1 %v4265_v32  ;;  %v771_v32 = vld [vmem:[%s6826_s5 + $0xf8] sm:$0xff] }
  0xfc   : > { %1210 = vmatpush1.bf16.msra.mxu1 %v4264_v31  ;;  %v767_v31 = vld [vmem:[%s6826_s5 + $0xd8] sm:$0xff] }
  0xfd   : > { %1211 = vmatprep.subr.bf16.mxu1 %v4257_v40  ;;  %v4285_v38 = vcombine.high %v767_v31, %v771_v32  ;;  %v762_v40 = vld [vmem:[%s6826_s5 + $0xb0] sm:$0xff]  ;;  %v4284_v45 = vcombine.low %v767_v31, %v771_v32 }
  0xfe   : > { %v4785_v31 = vld [vmem:[%s6828_s7 + $0x240] ss:$16 sps:$4 sm:$0xff]   ;;  %v4790_v32 = vld [vmem:[%s6828_s7 + $0x24] ss:$16 sps:$4 sm:$0xff]  }
 0x100   : > { %1212 = vmatpush1.bf16.msra.mxu1 %v4256_v39  ;;  %v758_v39 = vld [vmem:[%s6826_s5 + $0x90] sm:$0xff] }
 0x101   : > { %1343 = vmatprep.subr.bf16.mxu1 %v4317_v50  ;;  %v4275_v46 = vcombine.high %v758_v39, %v762_v40  ;;  %v4277_v50 = vcombine.high %v759_v41, %v763_v42  ;;  %v4805_v41 = vld [vmem:[%s6828_s7 + $0x3e4] ss:$16 sps:$4 sm:$0xff]   ;;  %v4800_v42 = vld [vmem:[%s6828_s7 + $0x1e0] ss:$16 sps:$4 sm:$0xff]  }
 0x1a3   : > { %v4712_v51 = vpop.f32.mrf.mxu1 }
 0x1a4   : > { %v706_v11 = vadd.f32 %v4712_v51, %v5511_v53  ;;  %v750_v51 = vld [vmem:[%s6826_s5 + $0x50] sm:$0xff] }
 0x1a5   : > { %v697_v52 = vpop.f32.mrf.mxu1 }
 0x1a6   : > { %v698_v55 = vadd.f32 %v5511_v53, %v697_v52  ;;  %v730_v22 = vmax.f32 %v706_v11, 0.0  ;;  %v754_v52 = vld [vmem:[%s6826_s5 + $0x70] sm:$0xff] }
 0x1a7   : > { %v4713_v54 = vpop.f32.mrf.mxu1  ;;  %v4267_v61 = vcombine.high %v750_v51, %v754_v52  ;;  %v4757_v11 = vld [vmem:[%s6828_s7 + $0x2e4] ss:$16 sps:$4 sm:$0xff]  }
 0x1a8   : > { %v728_v63 = vmax.f32 %v698_v55, 0.0  ;;  %v709_v2 = vadd.f32 %v4713_v54, %v5511_v53  ;;  %v751_v54 = vld [vmem:[%s6826_s5 + $0x58] sm:$0xff] }
 0x1a9   : > { %v700_v56 = vpop.f32.mrf.mxu1  ;;  %v755_v55 = vld [vmem:[%s6826_s5 + $0x78] sm:$0xff] }
 0x1aa   : > { %v701_v57 = vadd.f32 %v5511_v53, %v700_v56  ;;  %v731_v14 = vmax.f32 %v709_v2, 0.0  ;;  %v4269_v62 = vcombine.high %v751_v54, %v755_v55  ;;  %v4266_v2 = vcombine.low %v750_v51, %v754_v52  ;;  %v4812_v51 = vld [vmem:[%s6828_s7 + $0x1a0] ss:$16 sps:$4 sm:$0xff]  }
 0x1ab   : > { %v5518_v59 = vpop.f32.mrf.mxu1  ;;  %v4815_v52 = vld [vmem:[%s6828_s7 + $0x3a0] ss:$16 sps:$4 sm:$0xff]  }
 0x1ac   : > { %v729_v0 = vmax.f32 %v701_v57, 0.0  ;;  %v5561_v26 = vpack.c.bf16 %v731_v14, %v730_v22  ;;  %v722_v56 = vadd.f32 %v5518_v59, %v5511_v53  ;;  %v4274_v57 = vcombine.low %v758_v39, %v762_v40  ;;  %v743_v59 = vld [vmem:[%s6826_s5 + $0x18] sm:$0xff]  ;;  %v4760_v14 = vld [vmem:[%s6828_s7 + $0xc4] ss:$16 sps:$4 sm:$0xff]   ;;  %v4797_v39 = vld [vmem:[%s6828_s7 + $0x200] ss:$16 sps:$4 sm:$0xff]  }
 0x1ad   : > { %v713_v1 = vpop.f32.mrf.mxu1  ;;  %v4775_v22 = vld [vmem:[%s6828_s7 + $0x284] ss:$16 sps:$4 sm:$0xff]  }
 0x1ae   : > { %v5530_v3 = vpack.c.bf16 %v729_v0, %v728_v63  ;;  %v714_v33 = vadd.f32 %v5511_v53, %v713_v1  ;;  %v742_v63 = vld [vmem:[%s6826_s5 + $0x10] sm:$0xff]  ;;  %v747_v0 = vld [vmem:[%s6826_s5 + $0x38] sm:$0xff]  ;;  %v734_v1 = vmax.f32 %v722_v56, 0.0 }
 0x1af   : > { %v4717_v7 = vpop.f32.mrf.mxu1  ;;  %v4260_v9 = vcombine.low %v743_v59, %v747_v0  ;;  %v4802_v40 = vld [vmem:[%s6828_s7 + $0x1e4] ss:$16 sps:$4 sm:$0xff]   ;;  %v4818_v56 = vld [vmem:[%s6828_s7 + $0x180] ss:$16 sps:$4 sm:$0xff]  }
 0x1b0   : > { %1157 = vmatmul.mubr.bf16.vlgmr.msra.gmra.mxu0 %v5530_v3  ;;  %1230 = vmatmul.mubr.bf16.vlgmr.msra.gmra.mxu1 %v5530_v3  ;;  %v732_v43 = vmax.f32 %v714_v33, 0.0  ;;  %v4793_v33 = vld [vmem:[%s6828_s7 + $0x224] ss:$16 sps:$4 sm:$0xff]  }
 0x1b1   : > { %1271 = vmatpush1.bf16.msra.mxu0 %v4314_v48  ;;  %1344 = vmatpush1.bf16.msra.mxu1 %v4316_v49  ;;  %v716_v19 = vpop.f32.mrf.mxu1  ;;  %v725_v48 = vadd.f32 %v4717_v7, %v5511_v53  ;;  %v4261_v7 = vcombine.high %v743_v59, %v747_v0  ;;  %v4830_v59 = vld [vmem:[%s6828_s7 + $0x140] ss:$16 sps:$4 sm:$0xff]  }
 0x1b2   : > { %1272 = vmatprep.subr.bf16.mxu0 %v4307_v4  ;;  %1345 = vmatprep.subr.bf16.mxu1 %v4309_v5  ;;  %v717_v27 = vadd.f32 %v5511_v53, %v716_v19  ;;  %v746_v53 = vld [vmem:[%s6826_s5 + $0x30] sm:$0xff]  ;;  %v4268_v4 = vcombine.low %v751_v54, %v755_v55 }
 0x1b3   : > { %1166 = vmatprep.mubr.bf16.mxu0 %v5273_v47  ;;  %1239 = vmatprep.mubr.bf16.mxu1 %v5273_v47  ;;  %v735_v60 = vmax.f32 %v725_v48, 0.0  ;;  %v4259_v6 = vcombine.high %v742_v63, %v746_v53  ;;  %v4258_v8 = vcombine.low %v742_v63, %v746_v53  ;;  %v4764_v19 = vld [vmem:[%s6828_s7 + $0xa0] ss:$16 sps:$4 sm:$0xff]   ;;  %v4820_v54 = vld [vmem:[%s6828_s7 + $0x184] ss:$16 sps:$4 sm:$0xff]  }
 0x1b4   : > { %v733_v36 = vmax.f32 %v717_v27, 0.0  ;;  %v4776_v27 = vld [vmem:[%s6828_s7 + $0x60] ss:$16 sps:$4 sm:$0xff]   ;;  %v4823_v55 = vld [vmem:[%s6828_s7 + $0x384] ss:$16 sps:$4 sm:$0xff]  }
 0x1b5   : > { %1273 = vmatpush1.bf16.msra.mxu0 %v4306_v12  ;;  %1346 = vmatpush1.bf16.msra.mxu1 %v4308_v13  ;;  %v739_v5 = vpack.c.bf16 %v735_v60, %v734_v1  ;;  %v4752_v12 = vld [vmem:[%s6828_s7 + $0xe0] ss:$16 sps:$4 sm:$0xff]   ;;  %v4829_v60 = vld [vmem:[%s6828_s7 + $0x364] ss:$16 sps:$4 sm:$0xff]  }
 0x1b6   : > { %1274 = vmatprep.subr.bf16.mxu0 %v4299_v15  ;;  %1347 = vmatprep.subr.bf16.mxu1 %v4301_v16  ;;  %v5594_v49 = vpack.c.bf16 %v733_v36, %v732_v43  ;;  %v4755_v13 = vld [vmem:[%s6828_s7 + $0x2e0] ss:$16 sps:$4 sm:$0xff]   ;;  %v4763_v15 = vld [vmem:[%s6828_s7 + $0x2c4] ss:$16 sps:$4 sm:$0xff]  }
 0x1b7   : > { %v4758_v16 = vld [vmem:[%s6828_s7 + $0xc0] ss:$16 sps:$4 sm:$0xff]   ;;  %v4796_v36 = vld [vmem:[%s6828_s7 + $0x4] ss:$16 sps:$4 sm:$0xff]  }
 0x1b8   : > { %1167 = vmatmul.mubr.bf16.gmra.mxu0 %v5561_v26  ;;  %1240 = vmatmul.mubr.bf16.gmra.mxu1 %v5561_v26  ;;  %v4803_v43 = vld [vmem:[%s6828_s7 + $0x3e0] ss:$16 sps:$4 sm:$0xff]   ;;  %v4832_v63 = vld [vmem:[%s6828_s7 + $0x144] ss:$16 sps:$4 sm:$0xff]  }
 0x1b9   : > { %1275 = vmatpush1.bf16.msra.mxu0 %v4298_v23  ;;  %1348 = vmatpush1.bf16.msra.mxu1 %v4300_v24  ;;  %v4770_v23 = vld [vmem:[%s6828_s7 + $0x80] ss:$16 sps:$4 sm:$0xff]   ;;  %v4835_v53 = vld [vmem:[%s6828_s7 + $0x344] ss:$16 sps:$4 sm:$0xff]  }
 0x1ba   : > { %1276 = vmatprep.subr.bf16.mxu0 %v4291_v25  ;;  %1349 = vmatprep.subr.bf16.mxu1 %v4293_v28  ;;  %v4773_v24 = vld [vmem:[%s6828_s7 + $0x280] ss:$16 sps:$4 sm:$0xff]   ;;  %v4778_v25 = vld [vmem:[%s6828_s7 + $0x64] ss:$16 sps:$4 sm:$0xff]  }
 0x1bb   : > { %1176 = vmatprep.mubr.bf16.mxu0 %v5273_v47  ;;  %1249 = vmatprep.mubr.bf16.mxu1 %v5273_v47  ;;  %v4779_v28 = vld [vmem:[%s6828_s7 + $0x260] ss:$16 sps:$4 sm:$0xff]   ;;  %v4838_v1 = vld [vmem:[%s6828_s7 + $0x124] ss:$16 sps:$4 sm:$0xff]  }
 0x1bc   : > { %v4809_v48 = vld [vmem:[%s6828_s7 + $0x3c0] ss:$16 sps:$4 sm:$0xff]  }
 0x1bd   : > { %1277 = vmatpush1.bf16.msra.mxu0 %v4290_v34  ;;  %1350 = vmatpush1.bf16.msra.mxu1 %v4292_v35  ;;  %v4788_v34 = vld [vmem:[%s6828_s7 + $0x20] ss:$16 sps:$4 sm:$0xff]  }
 0x1be   : > { %1278 = vmatprep.subr.bf16.mxu0 %v4283_v37  ;;  %1351 = vmatprep.subr.bf16.mxu1 %v4285_v38  ;;  %v4791_v35 = vld [vmem:[%s6828_s7 + $0x220] ss:$16 sps:$4 sm:$0xff]   ;;  %v4799_v37 = vld [vmem:[%s6828_s7 + $0x204] ss:$16 sps:$4 sm:$0xff]  }
 0x1bf   : > { %v4794_v38 = vld [vmem:[%s6828_s7] ss:$16 sps:$4 sm:$0xff]  }
 0x1c0   : > { %1177 = vmatmul.mubr.bf16.gmra.mxu0 %v5594_v49  ;;  %1250 = vmatmul.mubr.bf16.gmra.mxu1 %v5594_v49  ;;  %v4833_v0 = vld [vmem:[%s6828_s7 + $0x340] ss:$16 sps:$4 sm:$0xff]  }
 0x1c1   : > { %1279 = vmatpush1.bf16.msra.mxu0 %v4282_v44  ;;  %1352 = vmatpush1.bf16.msra.mxu1 %v4284_v45  ;;  %v4808_v44 = vld [vmem:[%s6828_s7 + $0x1c4] ss:$16 sps:$4 sm:$0xff]  }
 0x1c2   : > { %1280 = vmatprep.subr.bf16.mxu0 %v4275_v46  ;;  %1353 = vmatprep.subr.bf16.mxu1 %v4277_v50  ;;  %v4811_v45 = vld [vmem:[%s6828_s7 + $0x3c4] ss:$16 sps:$4 sm:$0xff]   ;;  %v4806_v46 = vld [vmem:[%s6828_s7 + $0x1c0] ss:$16 sps:$4 sm:$0xff]  }
 0x1c3   : > { %1186 = vmatprep.mubr.bf16.mxu0 %v5273_v47  ;;  %1259 = vmatprep.mubr.bf16.mxu1 %v5273_v47  ;;  %v4817_v50 = vld [vmem:[%s6828_s7 + $0x3a4] ss:$16 sps:$4 sm:$0xff]  }
 0x1c5   : > { %1281 = vmatpush1.bf16.msra.mxu0 %v4274_v57  ;;  %1354 = vmatpush1.bf16.msra.mxu1 %v4276_v58  ;;  %v4821_v57 = vld [vmem:[%s6828_s7 + $0x380] ss:$16 sps:$4 sm:$0xff]   ;;  %v4826_v58 = vld [vmem:[%s6828_s7 + $0x164] ss:$16 sps:$4 sm:$0xff]  }
 0x1c6   : > { %1282 = vmatprep.subr.bf16.mxu0 %v4267_v61  ;;  %1355 = vmatprep.subr.bf16.mxu1 %v4269_v62  ;;  %v4824_v61 = vld [vmem:[%s6828_s7 + $0x160] ss:$16 sps:$4 sm:$0xff]  }
 0x1c7   : > { %v4827_v62 = vld [vmem:[%s6828_s7 + $0x360] ss:$16 sps:$4 sm:$0xff]  }
 0x1c8   : > { %1187 = vmatmul.mubr.bf16.gmra.mxu0 %v739_v5  ;;  %1260 = vmatmul.mubr.bf16.gmra.mxu1 %v739_v5 }
 0x1c9   : > { %1283 = vmatpush1.bf16.msra.mxu0 %v4266_v2  ;;  %1356 = vmatpush1.bf16.msra.mxu1 %v4268_v4  ;;  %v4841_v2 = vld [vmem:[%s6828_s7 + $0x324] ss:$16 sps:$4 sm:$0xff]   ;;  %v4836_v4 = vld [vmem:[%s6828_s7 + $0x120] ss:$16 sps:$4 sm:$0xff]  }
 0x1ca   : > { %1284 = vmatprep.subr.bf16.mxu0 %v4259_v6  ;;  %1357 = vmatprep.subr.bf16.mxu1 %v4261_v7  ;;  %v4844_v6 = vld [vmem:[%s6828_s7 + $0x104] ss:$16 sps:$4 sm:$0xff]  }
 0x1cb   : > { %1302 = vmatprep.mubr.bf16.mxu0 %v5273_v47  ;;  %1375 = vmatprep.mubr.bf16.mxu1 %v5273_v47  ;;  %v4847_v7 = vld [vmem:[%s6828_s7 + $0x304] ss:$16 sps:$4 sm:$0xff]  }
 0x1cd   : > { %1285 = vmatpush1.bf16.msra.mxu0 %v4258_v8  ;;  %1358 = vmatpush1.bf16.msra.mxu1 %v4260_v9  ;;  %v4842_v8 = vld [vmem:[%s6828_s7 + $0x100] ss:$16 sps:$4 sm:$0xff]  }
 0x1ce   : > { %3179 = vmatprep.subr.bf16.mxu0 %v4754_v10  ;;  %3220 = vmatprep.subr.bf16.mxu1 %v4757_v11  ;;  %v4845_v9 = vld [vmem:[%s6828_s7 + $0x300] ss:$16 sps:$4 sm:$0xff]   ;;  %v4850_v10 = vld [vmem:[%s6828_s7 + $0x4e4] ss:$16 sps:$4 sm:$0xff]  }
 0x1cf   : > { %v4853_v11 = vld [vmem:[%s6828_s7 + $0x6e4] ss:$16 sps:$4 sm:$0xff]  }
 0x1d0   : > { %1303 = vmatmul.mubr.bf16.vlgmr.msra.gmra.mxu0 %v5530_v3  ;;  %1376 = vmatmul.mubr.bf16.vlgmr.msra.gmra.mxu1 %v5530_v3  ;;  %v4766_v3 = vld [vmem:[%s6828_s7 + $0xa4] ss:$16 sps:$4 sm:$0xff]  }
 0x1d1   : > { %1312 = vmatprep.mubr.bf16.mxu0 %v5273_v47  ;;  %1385 = vmatprep.mubr.bf16.mxu1 %v5273_v47 }
 0x1d2   : > { %3180 = vmatpush1.bf16.msra.mxu0 %v4752_v12  ;;  %3221 = vmatpush1.bf16.msra.mxu1 %v4755_v13  ;;  %v1557_v12 = vlaneseq }
 0x1d3   : > { %3181 = vmatprep.subr.bf16.mxu0 %v4760_v14  ;;  %3222 = vmatprep.subr.bf16.mxu1 %v4763_v15 }
 0x1d4   : > { %v5838_v13 = vshrl.u32 %v1557_v12, 7 }
 0x1d6   : > { %3182 = vmatpush1.bf16.msra.mxu0 %v4758_v16  ;;  %3223 = vmatpush1.bf16.msra.mxu1 %v4761_v17  ;;  %v1575_v14 = vsub.s32 4, %v5838_v13  ;;  %v1583_v15 = vsub.s32 6, %v5838_v13  ;;  %v5845_v16 = vld [vmem:[%s6827_s6] sm:$0xff] }
 0x1d7   : > { %3183 = vmatprep.subr.bf16.mxu0 %v4766_v3  ;;  %3224 = vmatprep.subr.bf16.mxu1 %v4769_v18 }
 0x1d8   : > { %1313 = vmatmul.mubr.bf16.gmra.mxu0 %v5561_v26  ;;  %1386 = vmatmul.mubr.bf16.gmra.mxu1 %v5561_v26  ;;  %v4781_v26 = vld [vmem:[%s6828_s7 + $0x264] ss:$16 sps:$4 sm:$0xff]   ;;  %v5848_v17 = vrot.slane %v5845_v16, %v1575_v14  ;;  %v5851_v3 = vrot.slane %v5845_v16, %v1583_v15 }
 0x1d9   : > { %1322 = vmatprep.mubr.bf16.mxu0 %v5273_v47  ;;  %1395 = vmatprep.mubr.bf16.mxu1 %v5273_v47 }
 0x1da   : > { %3184 = vmatpush1.bf16.msra.mxu0 %v4764_v19  ;;  %3225 = vmatpush1.bf16.msra.mxu1 %v4767_v20 }
 0x1db   : > { %3185 = vmatprep.subr.bf16.mxu0 %v4772_v21  ;;  %3226 = vmatprep.subr.bf16.mxu1 %v4775_v22 }
 0x1de   : > { %3186 = vmatpush1.bf16.msra.mxu0 %v4770_v23  ;;  %3227 = vmatpush1.bf16.msra.mxu1 %v4773_v24 }
 0x1df   : > { %3187 = vmatprep.subr.bf16.mxu0 %v4778_v25  ;;  %3228 = vmatprep.subr.bf16.mxu1 %v4781_v26 }
 0x1e0   : > { %1323 = vmatmul.mubr.bf16.gmra.mxu0 %v5594_v49  ;;  %1396 = vmatmul.mubr.bf16.gmra.mxu1 %v5594_v49  ;;  %v4814_v49 = vld [vmem:[%s6828_s7 + $0x1a4] ss:$16 sps:$4 sm:$0xff]  }
 0x1e1   : > { %1332 = vmatprep.mubr.bf16.mxu0 %v5273_v47  ;;  %1405 = vmatprep.mubr.bf16.mxu1 %v5273_v47  ;;  %v4784_v47 = vld [vmem:[%s6828_s7 + $0x44] ss:$16 sps:$4 sm:$0xff]  }
 0x1e2   : > { %3188 = vmatpush1.bf16.msra.mxu0 %v4776_v27  ;;  %3229 = vmatpush1.bf16.msra.mxu1 %v4779_v28 }
 0x1e3   : > { %3189 = vmatprep.subr.bf16.mxu0 %v4784_v47  ;;  %3230 = vmatprep.subr.bf16.mxu1 %v4787_v29 }
 0x1e6   : > { %3190 = vmatpush1.bf16.msra.mxu0 %v4782_v30  ;;  %3231 = vmatpush1.bf16.msra.mxu1 %v4785_v31 }
 0x1e7   : > { %3191 = vmatprep.subr.bf16.mxu0 %v4790_v32  ;;  %3232 = vmatprep.subr.bf16.mxu1 %v4793_v33 }
 0x1e8   : > { %1333 = vmatmul.mubr.bf16.gmra.mxu0 %v739_v5  ;;  %1406 = vmatmul.mubr.bf16.gmra.mxu1 %v739_v5  ;;  %v4839_v5 = vld [vmem:[%s6828_s7 + $0x320] ss:$16 sps:$4 sm:$0xff]  }
 0x1ea   : > { %3192 = vmatpush1.bf16.msra.mxu0 %v4788_v34  ;;  %3233 = vmatpush1.bf16.msra.mxu1 %v4791_v35 }
 0x1eb   : > { %3193 = vmatprep.subr.bf16.mxu0 %v4796_v36  ;;  %3234 = vmatprep.subr.bf16.mxu1 %v4799_v37 }
 0x1ee   : > { %3194 = vmatpush1.bf16.msra.mxu0 %v4794_v38  ;;  %3235 = vmatpush1.bf16.msra.mxu1 %v4797_v39 }
 0x1ef   : > { %3195 = vmatprep.subr.bf16.mxu0 %v4802_v40  ;;  %3236 = vmatprep.subr.bf16.mxu1 %v4805_v41 }
 0x1f2   : > { %3196 = vmatpush2.bf16.msra.mxu0 %v4800_v42  ;;  %3237 = vmatpush2.bf16.msra.mxu1 %v4803_v43 }
 0x1f3   : > { %3197 = vmatprep.subr.bf16.mxu0 %v4808_v44  ;;  %3238 = vmatprep.subr.bf16.mxu1 %v4811_v45 }
 0x1f6   : > { %3198 = vmatpush2.bf16.msra.mxu0 %v4806_v46  ;;  %3239 = vmatpush2.bf16.msra.mxu1 %v4809_v48 }
 0x1f7   : > { %3199 = vmatprep.subr.bf16.mxu0 %v4814_v49  ;;  %3240 = vmatprep.subr.bf16.mxu1 %v4817_v50 }
 0x1fa   : > { %3200 = vmatpush2.bf16.msra.mxu0 %v4812_v51  ;;  %3241 = vmatpush2.bf16.msra.mxu1 %v4815_v52 }
 0x1fb   : > { %3201 = vmatprep.subr.bf16.mxu0 %v4820_v54  ;;  %3242 = vmatprep.subr.bf16.mxu1 %v4823_v55 }
 0x1fe   : > { %3202 = vmatpush2.bf16.msra.mxu0 %v4818_v56  ;;  %3243 = vmatpush2.bf16.msra.mxu1 %v4821_v57 }
 0x1ff   : > { %3203 = vmatprep.subr.bf16.mxu0 %v4826_v58  ;;  %3244 = vmatprep.subr.bf16.mxu1 %v4829_v60 }
 0x202   : > { %3204 = vmatpush2.bf16.msra.mxu0 %v4824_v61  ;;  %3245 = vmatpush2.bf16.msra.mxu1 %v4827_v62 }
 0x203   : > { %3205 = vmatprep.subr.bf16.mxu0 %v4832_v63  ;;  %3246 = vmatprep.subr.bf16.mxu1 %v4835_v53 }
 0x206   : > { %3206 = vmatpush2.bf16.msra.mxu0 %v4830_v59  ;;  %3247 = vmatpush2.bf16.msra.mxu1 %v4833_v0 }
 0x207   : > { %3207 = vmatprep.subr.bf16.mxu0 %v4838_v1  ;;  %3248 = vmatprep.subr.bf16.mxu1 %v4841_v2 }
 0x20a   : > { %3208 = vmatpush2.bf16.msra.mxu0 %v4836_v4  ;;  %3249 = vmatpush2.bf16.msra.mxu1 %v4839_v5 }
 0x20b   : > { %3209 = vmatprep.subr.bf16.mxu0 %v4844_v6  ;;  %3250 = vmatprep.subr.bf16.mxu1 %v4847_v7 }
 0x20e   : > { %3210 = vmatpush2.bf16.msra.mxu0 %v4842_v8  ;;  %3251 = vmatpush2.bf16.msra.mxu1 %v4845_v9 }
 0x20f   : > { %3261 = vmatprep.subr.bf16.mxu0 %v4850_v10  ;;  %3302 = vmatprep.subr.bf16.mxu1 %v4853_v11 }
 0x270   : > { %v1158_v18 = vpop.f32.mrf.mxu0  ;;  %v1231_v19 = vpop.f32.mrf.mxu1 }
 0x272   : > { %v1160_v20 = vpop.f32.mrf.mxu0  ;;  %v1233_v21 = vpop.f32.mrf.mxu1 }
 0x274   : > { %v1162_v22 = vpop.f32.mrf.mxu0  ;;  %v1235_v23 = vpop.f32.mrf.mxu1 }
 0x275   : > { %v1424_v35 = vmax.f32 %v1158_v18, %v1162_v22  ;;  %v1438_v36 = vmax.f32 %v1231_v19, %v1235_v23 }
 0x276   : > { %v1164_v24 = vpop.f32.mrf.mxu0  ;;  %v1237_v25 = vpop.f32.mrf.mxu1 }
 0x277   : > { %v1431_v39 = vmax.f32 %v1160_v20, %v1164_v24  ;;  %v1445_v40 = vmax.f32 %v1233_v21, %v1237_v25 }
 0x278   : > { %v1168_v26 = vpop.f32.mrf.mxu0  ;;  %v1241_v27 = vpop.f32.mrf.mxu1 }
 0x279   : > { %v1425_v41 = vmax.f32 %v1424_v35, %v1168_v26  ;;  %v1439_v42 = vmax.f32 %v1438_v36, %v1241_v27  ;;  %v5858_v26 = vsub.s32 0, %v5838_v13  ;;  %v1567_v27 = vsub.s32 2, %v5838_v13 }
 0x27a   : > { %v1170_v28 = vpop.f32.mrf.mxu0  ;;  %v1243_v47 = vpop.f32.mrf.mxu1 }
 0x27b   : > { %v1432_v45 = vmax.f32 %v1431_v39, %v1170_v28  ;;  %v1446_v46 = vmax.f32 %v1445_v40, %v1243_v47  ;;  %v1560_v39 = vrot.slane %v5845_v16, %v5858_v26  ;;  %v1568_v40 = vrot.slane %v5845_v16, %v1567_v27 }
 0x27c   : > { %v1172_v29 = vpop.f32.mrf.mxu0  ;;  %v1245_v30 = vpop.f32.mrf.mxu1 }
 0x27d   : > { %v1426_v48 = vmax.f32 %v1425_v41, %v1172_v29  ;;  %v1440_v49 = vmax.f32 %v1439_v42, %v1245_v30 }
 0x27e   : > { %v1174_v31 = vpop.f32.mrf.mxu0  ;;  %v1247_v32 = vpop.f32.mrf.mxu1 }
 0x27f   : > { %v1433_v52 = vmax.f32 %v1432_v45, %v1174_v31  ;;  %v1447_v54 = vmax.f32 %v1446_v46, %v1247_v32 }
 0x280   : > { %v1178_v33 = vpop.f32.mrf.mxu0  ;;  %v1251_v34 = vpop.f32.mrf.mxu1 }
 0x281   : > { %v1427_v55 = vmax.f32 %v1426_v48, %v1178_v33  ;;  %v1441_v56 = vmax.f32 %v1440_v49, %v1251_v34 }
 0x282   : > { %v1180_v37 = vpop.f32.mrf.mxu0  ;;  %v1253_v38 = vpop.f32.mrf.mxu1 }
 0x283   : > { %v1434_v60 = vmax.f32 %v1433_v52, %v1180_v37  ;;  %v1448_v61 = vmax.f32 %v1447_v54, %v1253_v38 }
 0x284   : > { %v1182_v43 = vpop.f32.mrf.mxu0  ;;  %v1255_v44 = vpop.f32.mrf.mxu1 }
 0x285   : > { %v1428_v62 = vmax.f32 %v1427_v55, %v1182_v43  ;;  %v1442_v63 = vmax.f32 %v1441_v56, %v1255_v44  ;;  %v5875_v43 = vsub.s32 1, %v5838_v13  ;;  %v1571_v44 = vsub.s32 3, %v5838_v13 }
 0x286   : > { %v1184_v50 = vpop.f32.mrf.mxu0  ;;  %v1257_v51 = vpop.f32.mrf.mxu1 }
 0x287   : > { %v1435_v0 = vmax.f32 %v1434_v60, %v1184_v50  ;;  %v1449_v1 = vmax.f32 %v1448_v61, %v1257_v51  ;;  %v1564_v60 = vrot.slane %v5845_v16, %v5875_v43  ;;  %v1572_v61 = vrot.slane %v5845_v16, %v1571_v44 }
 0x288   : > { %v1188_v57 = vpop.f32.mrf.mxu0  ;;  %v1261_v58 = vpop.f32.mrf.mxu1 }
 0x289   : > { %v1429_v2 = vmax.f32 %v1428_v62, %v1188_v57  ;;  %v1443_v4 = vmax.f32 %v1442_v63, %v1261_v58 }
 0x28a   : > { %v1190_v53 = vpop.f32.mrf.mxu0  ;;  %v1263_v59 = vpop.f32.mrf.mxu1 }
 0x28b   : > { %v1436_v7 = vmax.f32 %v1435_v0, %v1190_v53  ;;  %v1450_v8 = vmax.f32 %v1449_v1, %v1263_v59 }
 0x28c   : > { %v1192_v5 = vpop.f32.mrf.mxu0  ;;  %v1265_v6 = vpop.f32.mrf.mxu1 }
 0x28d   : > { %v1430_v9 = vmax.f32 %v1429_v2, %v1192_v5  ;;  %v1444_v10 = vmax.f32 %v1443_v4, %v1265_v6 }
 0x28e   : > { %v1194_v11 = vpop.f32.mrf.mxu0  ;;  %v1267_v12 = vpop.f32.mrf.mxu1 }
 0x28f   : > { %v1507_v14 = vrot.slane %v1430_v9, 4  ;;  %v1519_v15 = vrot.slane %v1444_v10, 4  ;;  %v1437_v18 = vmax.f32 %v1436_v7, %v1194_v11  ;;  %v1451_v19 = vmax.f32 %v1450_v8, %v1267_v12 }
 0x290   : > { %v5853_v20 = vpop.f32.mrf.mxu0  ;;  %v5855_v21 = vpop.f32.mrf.mxu1 }
 0x291   : > { %v1508_v22 = vmax.f32 %v1430_v9, %v1507_v14  ;;  %v1520_v23 = vmax.f32 %v1444_v10, %v1519_v15  ;;  %v1513_v24 = vrot.slane %v1437_v18, 4  ;;  %v1525_v25 = vrot.slane %v1451_v19, 4 }
 0x292   : > { %v5861_v28 = vpop.f32.mrf.mxu0  ;;  %v5863_v47 = vpop.f32.mrf.mxu1 }
 0x293   : > { %v1509_v29 = vrot.slane %v1508_v22, 2  ;;  %v1521_v30 = vrot.slane %v1520_v23, 2  ;;  %v1514_v31 = vmax.f32 %v1437_v18, %v1513_v24  ;;  %v1526_v32 = vmax.f32 %v1451_v19, %v1525_v25 }
 0x294   : > { %v5865_v33 = vpop.f32.mrf.mxu0  ;;  %v5867_v34 = vpop.f32.mrf.mxu1 }
 0x295   : > { %v1510_v35 = vmax.f32 %v1508_v22, %v1509_v29  ;;  %v1522_v36 = vmax.f32 %v1520_v23, %v1521_v30  ;;  %v1515_v37 = vrot.slane %v1514_v31, 2  ;;  %v1527_v38 = vrot.slane %v1526_v32, 2  ;;  %v4848_v22 = vld [vmem:[%s6828_s7 + $0x4e0] ss:$16 sps:$4 sm:$0xff]  }
 0x296   : > { %v1310_v41 = vpop.f32.mrf.mxu0  ;;  %v1383_v42 = vpop.f32.mrf.mxu1  ;;  %v4851_v23 = vld [vmem:[%s6828_s7 + $0x6e0] ss:$16 sps:$4 sm:$0xff]  }
 0x297   : > { %v1511_v45 = vrot.slane %v1510_v35, 1  ;;  %v1523_v46 = vrot.slane %v1522_v36, 1  ;;  %v1516_v48 = vmax.f32 %v1514_v31, %v1515_v37  ;;  %v1528_v49 = vmax.f32 %v1526_v32, %v1527_v38  ;;  %v4856_v31 = vld [vmem:[%s6828_s7 + $0x4c4] ss:$16 sps:$4 sm:$0xff]  }
 0x298   : > { %v5878_v50 = vpop.f32.mrf.mxu0  ;;  %v5880_v51 = vpop.f32.mrf.mxu1  ;;  %v1459_v29 = vmax.f32 %v5861_v28, %v1310_v41  ;;  %v1473_v30 = vmax.f32 %v5863_v47, %v1383_v42  ;;  %v4859_v32 = vld [vmem:[%s6828_s7 + $0x6c4] ss:$16 sps:$4 sm:$0xff]  }
 0x299   : > { %v1512_v52 = vmax.f32 %v1510_v35, %v1511_v45  ;;  %v1524_v54 = vmax.f32 %v1522_v36, %v1523_v46  ;;  %v1517_v55 = vrot.slane %v1516_v48, 1  ;;  %v1529_v56 = vrot.slane %v1528_v49, 1  ;;  %v4862_v45 = vld [vmem:[%s6828_s7 + $0x4a4] ss:$16 sps:$4 sm:$0xff]  }
 0x29a   : > { %v1316_v57 = vpop.f32.mrf.mxu0  ;;  %v1389_v58 = vpop.f32.mrf.mxu1  ;;  %v4865_v46 = vld [vmem:[%s6828_s7 + $0x6a4] ss:$16 sps:$4 sm:$0xff]  }
 0x29b   : > { %v1597_v62 = vadd.f32 %v1560_v39, %v1512_v52  ;;  %v1599_v63 = vadd.f32 %v1568_v40, %v1524_v54  ;;  %v1518_v53 = vmax.f32 %v1516_v48, %v1517_v55  ;;  %v1530_v59 = vmax.f32 %v1528_v49, %v1529_v56  ;;  %v4854_v39 = vld [vmem:[%s6828_s7 + $0x4c0] ss:$16 sps:$4 sm:$0xff]  }
 0x29c   : > { %v5887_v0 = vpop.f32.mrf.mxu0  ;;  %v5889_v1 = vpop.f32.mrf.mxu1  ;;  %v1460_v37 = vmax.f32 %v1459_v29, %v1316_v57  ;;  %v1474_v28 = vmax.f32 %v1473_v30, %v1389_v58  ;;  %v4857_v40 = vld [vmem:[%s6828_s7 + $0x6c0] ss:$16 sps:$4 sm:$0xff]   ;;  %v1452_v29 = vmax.f32 %v5853_v20, %v5865_v33  ;;  %v4880_v20 = vld [vmem:[%s6828_s7 + $0x444] ss:$16 sps:$4 sm:$0xff]  }
 0x29d   : > { %v1598_v5 = vadd.f32 %v1564_v60, %v1518_v53  ;;  %v1600_v6 = vadd.f32 %v1572_v61, %v1530_v59  ;;  %v1605_v7 = vmax.f32 %v1597_v62, 0.0  ;;  %v1607_v8 = vmax.f32 %v1599_v63, 0.0  ;;  %v4860_v57 = vld [vmem:[%s6828_s7 + $0x4a0] ss:$16 sps:$4 sm:$0xff]   ;;  %v4868_v62 = vld [vmem:[%s6828_s7 + $0x484] ss:$16 sps:$4 sm:$0xff]  }
 0x29e   : > { %v1320_v2 = vpop.f32.mrf.mxu0  ;;  %v1393_v4 = vpop.f32.mrf.mxu1  ;;  %v4863_v58 = vld [vmem:[%s6828_s7 + $0x6a0] ss:$16 sps:$4 sm:$0xff]   ;;  %v4871_v63 = vld [vmem:[%s6828_s7 + $0x684] ss:$16 sps:$4 sm:$0xff]  }
 0x29f   : > { %v1606_v11 = vmax.f32 %v1598_v5, 0.0  ;;  %v1608_v12 = vmax.f32 %v1600_v6, 0.0  ;;  %v5905_v24 = vpack.c.bf16 %v1605_v7, %v1605_v7  ;;  %v5907_v25 = vpack.c.bf16 %v1607_v8, %v1607_v8  ;;  %v4866_v7 = vld [vmem:[%s6828_s7 + $0x480] ss:$16 sps:$4 sm:$0xff]   ;;  %v4883_v33 = vld [vmem:[%s6828_s7 + $0x644] ss:$16 sps:$4 sm:$0xff]  }
 0x2a0   : > { %v5891_v9 = vpop.f32.mrf.mxu0  ;;  %v5893_v10 = vpop.f32.mrf.mxu1  ;;  %v1461_v41 = vmax.f32 %v1460_v37, %v1320_v2  ;;  %v1475_v42 = vmax.f32 %v1474_v28, %v1393_v4  ;;  %v4869_v8 = vld [vmem:[%s6828_s7 + $0x680] ss:$16 sps:$4 sm:$0xff]  }
 0x2a1   : > { %v5895_v18 = vpack.c.bf16 %v1606_v11, %v1606_v11  ;;  %v5897_v19 = vpack.c.bf16 %v1608_v12, %v1608_v12  ;;  %v4872_v30 = vld [vmem:[%s6828_s7 + $0x460] ss:$16 sps:$4 sm:$0xff]  }
 0x2a2   : > { %v1326_v14 = vpop.f32.mrf.mxu0  ;;  %v1399_v15 = vpop.f32.mrf.mxu1 }
 0x2a3   : > { %3211 = vmatprep.mubr.bf16.mxu0 %v5895_v18  ;;  %3252 = vmatprep.mubr.bf16.mxu1 %v5897_v19  ;;  %v1462_v52 = vmax.f32 %v1461_v41, %v1326_v14  ;;  %v1476_v54 = vmax.f32 %v1475_v42, %v1399_v15  ;;  %v4874_v14 = vld [vmem:[%s6828_s7 + $0x464] ss:$16 sps:$4 sm:$0xff]   ;;  %v4878_v42 = vld [vmem:[%s6828_s7 + $0x440] ss:$16 sps:$4 sm:$0xff]  }
 0x2a4   : > { %v5919_v35 = vpop.f32.mrf.mxu0  ;;  %v5921_v36 = vpop.f32.mrf.mxu1  ;;  %3212 = vmatmul.mubr.bf16.vlgmr.msra.gmra.mxu0 %v5905_v24  ;;  %3253 = vmatmul.mubr.bf16.vlgmr.msra.gmra.mxu1 %v5907_v25  ;;  %v4877_v15 = vld [vmem:[%s6828_s7 + $0x664] ss:$16 sps:$4 sm:$0xff]  }
 0x2a5   : > { %3262 = vmatpush1.bf16.msra.mxu0 %v4848_v22  ;;  %3303 = vmatpush1.bf16.msra.mxu1 %v4851_v23 }
 0x2a6   : > { %v1330_v47 = vpop.f32.mrf.mxu0  ;;  %v1403_v38 = vpop.f32.mrf.mxu1  ;;  %3263 = vmatprep.subr.bf16.mxu0 %v4856_v31  ;;  %3304 = vmatprep.subr.bf16.mxu1 %v4859_v32  ;;  %v4875_v31 = vld [vmem:[%s6828_s7 + $0x660] ss:$16 sps:$4 sm:$0xff]   ;;  %v1466_v32 = vmax.f32 %v5855_v21, %v5867_v34  ;;  %v1587_v34 = vsub.s32 7, %v5838_v13 }
 0x2a7   : > { %v1463_v60 = vmax.f32 %v1462_v52, %v1330_v47  ;;  %v1477_v61 = vmax.f32 %v1476_v54, %v1403_v38  ;;  %v1453_v47 = vmax.f32 %v1452_v29, %v5878_v50  ;;  %v1579_v38 = vsub.s32 5, %v5838_v13  ;;  %v4881_v50 = vld [vmem:[%s6828_s7 + $0x640] ss:$16 sps:$4 sm:$0xff]   ;;  %v4889_v52 = vld [vmem:[%s6828_s7 + $0x624] ss:$16 sps:$4 sm:$0xff]  }
 0x2a8   : > { %v5937_v48 = vpop.f32.mrf.mxu0  ;;  %v5939_v49 = vpop.f32.mrf.mxu1 }
 0x2a9   : > { %3264 = vmatpush1.bf16.msra.mxu0 %v4854_v39  ;;  %3305 = vmatpush1.bf16.msra.mxu1 %v4857_v40  ;;  %v1467_v39 = vmax.f32 %v1466_v32, %v5880_v51  ;;  %v1454_v41 = vmax.f32 %v1453_v47, %v5887_v0  ;;  %v4886_v0 = vld [vmem:[%s6828_s7 + $0x424] ss:$16 sps:$4 sm:$0xff]   ;;  %v4902_v32 = vld [vmem:[%s6828_s7 + $0x5c0] ss:$16 sps:$4 sm:$0xff]  }
 0x2aa   : > { %v1336_v55 = vpop.f32.mrf.mxu0  ;;  %v1409_v56 = vpop.f32.mrf.mxu1  ;;  %3265 = vmatprep.subr.bf16.mxu0 %v4862_v45  ;;  %3306 = vmatprep.subr.bf16.mxu1 %v4865_v46  ;;  %v4913_v47 = vld [vmem:[%s6828_s7 + $0x7a4] ss:$16 sps:$4 sm:$0xff]  }
 0x2ab   : > { %v1464_v2 = vmax.f32 %v1463_v60, %v1336_v55  ;;  %v1478_v4 = vmax.f32 %v1477_v61, %v1409_v56  ;;  %v1468_v45 = vmax.f32 %v1467_v39, %v5889_v1  ;;  %v1455_v54 = vmax.f32 %v1454_v41, %v5891_v9  ;;  %v4884_v61 = vld [vmem:[%s6828_s7 + $0x420] ss:$16 sps:$4 sm:$0xff]   ;;  %v4919_v41 = vld [vmem:[%s6828_s7 + $0x784] ss:$16 sps:$4 sm:$0xff]  }
 0x2ac   : > { %v5953_v53 = vpop.f32.mrf.mxu0  ;;  %v5955_v59 = vpop.f32.mrf.mxu1  ;;  %v1580_v55 = vrot.slane %v5845_v16, %v1579_v38  ;;  %v4887_v9 = vld [vmem:[%s6828_s7 + $0x620] ss:$16 sps:$4 sm:$0xff]  }
 0x2ad   : > { %3266 = vmatpush1.bf16.msra.mxu0 %v4860_v57  ;;  %3307 = vmatpush1.bf16.msra.mxu1 %v4863_v58  ;;  %v1469_v56 = vmax.f32 %v1468_v45, %v5893_v10  ;;  %v1588_v58 = vrot.slane %v5845_v16, %v1587_v34  ;;  %v1456_v60 = vmax.f32 %v1455_v54, %v5919_v35  ;;  %v4892_v16 = vld [vmem:[%s6828_s7 + $0x404] ss:$16 sps:$4 sm:$0xff]   ;;  %v4908_v38 = vld [vmem:[%s6828_s7 + $0x5a0] ss:$16 sps:$4 sm:$0xff]  }
 0x2ae   : > { %v1340_v5 = vpop.f32.mrf.mxu0  ;;  %v1413_v6 = vpop.f32.mrf.mxu1  ;;  %3267 = vmatprep.subr.bf16.mxu0 %v4868_v62  ;;  %3308 = vmatprep.subr.bf16.mxu1 %v4871_v63  ;;  %v4895_v35 = vld [vmem:[%s6828_s7 + $0x604] ss:$16 sps:$4 sm:$0xff]   ;;  %v4911_v39 = vld [vmem:[%s6828_s7 + $0x7a0] ss:$16 sps:$4 sm:$0xff]  }
 0x2af   : > { %v1465_v11 = vmax.f32 %v1464_v2, %v1340_v5  ;;  %v1479_v12 = vmax.f32 %v1478_v4, %v1413_v6  ;;  %v1470_v62 = vmax.f32 %v1469_v56, %v5921_v36  ;;  %v1457_v2 = vmax.f32 %v1456_v60, %v5937_v48  ;;  %v4890_v36 = vld [vmem:[%s6828_s7 + $0x400] ss:$16 sps:$4 sm:$0xff]   ;;  %v4898_v48 = vld [vmem:[%s6828_s7 + $0x5e4] ss:$16 sps:$4 sm:$0xff]  }
 0x2b0   : > { %v4916_v34 = vld [vmem:[%s6828_s7 + $0x584] ss:$16 sps:$4 sm:$0xff]   ;;  %v4923_v54 = vld [vmem:[%s6828_s7 + $0x760] ss:$16 sps:$4 sm:$0xff]  }
 0x2b1   : > { %v1537_v22 = vrot.slane %v1465_v11, 4  ;;  %v1549_v23 = vrot.slane %v1479_v12, 4  ;;  %3268 = vmatpush1.bf16.msra.mxu0 %v4866_v7  ;;  %3309 = vmatpush1.bf16.msra.mxu1 %v4869_v8  ;;  %v1471_v4 = vmax.f32 %v1470_v62, %v5939_v49  ;;  %v4893_v7 = vld [vmem:[%s6828_s7 + $0x600] ss:$16 sps:$4 sm:$0xff]   ;;  %v1458_v8 = vmax.f32 %v1457_v2, %v5953_v53  ;;  %v4934_v62 = vld [vmem:[%s6828_s7 + $0x524] ss:$16 sps:$4 sm:$0xff]  }
 0x2b2   : > { %3269 = vmatprep.subr.bf16.mxu0 %v4874_v14  ;;  %3310 = vmatprep.subr.bf16.mxu1 %v4877_v15  ;;  %v4901_v14 = vld [vmem:[%s6828_s7 + $0x7e4] ss:$16 sps:$4 sm:$0xff]   ;;  %v4896_v53 = vld [vmem:[%s6828_s7 + $0x5e0] ss:$16 sps:$4 sm:$0xff]  }
 0x2b3   : > { %v1538_v37 = vmax.f32 %v1465_v11, %v1537_v22  ;;  %v1550_v28 = vmax.f32 %v1479_v12, %v1549_v23  ;;  %v1472_v11 = vmax.f32 %v1471_v4, %v5955_v59  ;;  %v4899_v59 = vld [vmem:[%s6828_s7 + $0x7e0] ss:$16 sps:$4 sm:$0xff]   ;;  %v1531_v23 = vrot.slane %v1458_v8, 4  ;;  %v4943_v2 = vld [vmem:[%s6828_s7 + $0x704] ss:$16 sps:$4 sm:$0xff]  }
 0x2b4   : > { %v4929_v60 = vld [vmem:[%s6828_s7 + $0x740] ss:$16 sps:$4 sm:$0xff]  }
 0x2b5   : > { %v1539_v40 = vrot.slane %v1538_v37, 2  ;;  %v1551_v21 = vrot.slane %v1550_v28, 2  ;;  %3270 = vmatpush1.bf16.msra.mxu0 %v4872_v30  ;;  %3311 = vmatpush1.bf16.msra.mxu1 %v4875_v31  ;;  %v1543_v29 = vrot.slane %v1472_v11, 4  ;;  %v4904_v30 = vld [vmem:[%s6828_s7 + $0x5c4] ss:$16 sps:$4 sm:$0xff]  }
 0x2b6   : > { %3271 = vmatprep.subr.bf16.mxu0 %v4880_v20  ;;  %3312 = vmatprep.subr.bf16.mxu1 %v4883_v33  ;;  %v4907_v31 = vld [vmem:[%s6828_s7 + $0x7c4] ss:$16 sps:$4 sm:$0xff]  }
 0x2b7   : > { %v1540_v46 = vmax.f32 %v1538_v37, %v1539_v40  ;;  %v1552_v51 = vmax.f32 %v1550_v28, %v1551_v21  ;;  %v4905_v37 = vld [vmem:[%s6828_s7 + $0x7c0] ss:$16 sps:$4 sm:$0xff]   ;;  %v1532_v28 = vmax.f32 %v1458_v8, %v1531_v23  ;;  %v1544_v20 = vmax.f32 %v1472_v11, %v1543_v29  ;;  %v4910_v33 = vld [vmem:[%s6828_s7 + $0x5a4] ss:$16 sps:$4 sm:$0xff]   ;;  %v4944_v11 = vld [vmem:[%s6828_s7 + $0xe8] ss:$16 sps:$4 sm:$0xff]  }
 0x2b8   : > { %v4953_v23 = vld [vmem:[%s6828_s7 + $0x2c8] ss:$16 sps:$4 sm:$0xff]   ;;  %v4958_v29 = vld [vmem:[%s6828_s7 + $0xac] ss:$16 sps:$4 sm:$0xff]  }
 0x2b9   : > { %v1541_v57 = vrot.slane %v1540_v46, 1  ;;  %v1553_v1 = vrot.slane %v1552_v51, 1  ;;  %3272 = vmatpush1.bf16.msra.mxu0 %v4878_v42  ;;  %3313 = vmatpush1.bf16.msra.mxu1 %v4881_v50  ;;  %v1533_v40 = vrot.slane %v1532_v28, 2  ;;  %v1545_v21 = vrot.slane %v1544_v20, 2  ;;  %v4914_v42 = vld [vmem:[%s6828_s7 + $0x580] ss:$16 sps:$4 sm:$0xff]  }
 0x2ba   : > { %3273 = vmatprep.subr.bf16.mxu0 %v4886_v0  ;;  %3314 = vmatprep.subr.bf16.mxu1 %v4889_v52  ;;  %v4917_v50 = vld [vmem:[%s6828_s7 + $0x780] ss:$16 sps:$4 sm:$0xff]   ;;  %v4925_v0 = vld [vmem:[%s6828_s7 + $0x764] ss:$16 sps:$4 sm:$0xff]  }
 0x2bb   : > { %v1542_v63 = vmax.f32 %v1540_v46, %v1541_v57  ;;  %v1554_v10 = vmax.f32 %v1552_v51, %v1553_v1  ;;  %v1534_v45 = vmax.f32 %v1532_v28, %v1533_v40  ;;  %v1546_v46 = vmax.f32 %v1544_v20, %v1545_v21  ;;  %v4922_v51 = vld [vmem:[%s6828_s7 + $0x564] ss:$16 sps:$4 sm:$0xff]   ;;  %v4920_v52 = vld [vmem:[%s6828_s7 + $0x560] ss:$16 sps:$4 sm:$0xff]   ;;  %v4965_v28 = vld [vmem:[%s6828_s7 + $0x288] ss:$16 sps:$4 sm:$0xff]  }
 0x2bc   : > { %v4928_v57 = vld [vmem:[%s6828_s7 + $0x544] ss:$16 sps:$4 sm:$0xff]   ;;  %v4970_v20 = vld [vmem:[%s6828_s7 + $0x6c] ss:$16 sps:$4 sm:$0xff]   ;;  %v4974_v21 = vld [vmem:[%s6828_s7 + $0x48] ss:$16 sps:$4 sm:$0xff]  }
 0x2bd   : > { %v1602_v5 = vadd.f32 %v1580_v55, %v1542_v63  ;;  %v1604_v6 = vadd.f32 %v1588_v58, %v1554_v10  ;;  %3274 = vmatpush1.bf16.msra.mxu0 %v4884_v61  ;;  %3315 = vmatpush1.bf16.msra.mxu1 %v4887_v9  ;;  %v1535_v55 = vrot.slane %v1534_v45, 1  ;;  %v1547_v56 = vrot.slane %v1546_v46, 1  ;;  %v4931_v1 = vld [vmem:[%s6828_s7 + $0x744] ss:$16 sps:$4 sm:$0xff]   ;;  %v4926_v58 = vld [vmem:[%s6828_s7 + $0x540] ss:$16 sps:$4 sm:$0xff]  }
 0x2be   : > { %3275 = vmatprep.subr.bf16.mxu0 %v4892_v16  ;;  %3316 = vmatprep.subr.bf16.mxu1 %v4895_v35  ;;  %v4937_v63 = vld [vmem:[%s6828_s7 + $0x724] ss:$16 sps:$4 sm:$0xff]   ;;  %v4932_v10 = vld [vmem:[%s6828_s7 + $0x520] ss:$16 sps:$4 sm:$0xff]   ;;  %v4979_v40 = vld [vmem:[%s6828_s7 + $0x24c] ss:$16 sps:$4 sm:$0xff]  }
 0x2bf   : > { %v1610_v49 = vmax.f32 %v1602_v5, 0.0  ;;  %v1612_v12 = vmax.f32 %v1604_v6, 0.0  ;;  %v1536_v61 = vmax.f32 %v1534_v45, %v1535_v55  ;;  %v1548_v9 = vmax.f32 %v1546_v46, %v1547_v56  ;;  %v4935_v16 = vld [vmem:[%s6828_s7 + $0x720] ss:$16 sps:$4 sm:$0xff]   ;;  %v4940_v35 = vld [vmem:[%s6828_s7 + $0x504] ss:$16 sps:$4 sm:$0xff]  }
 0x2c0   : > { %v4938_v6 = vld [vmem:[%s6828_s7 + $0x500] ss:$16 sps:$4 sm:$0xff]   ;;  %v4983_v45 = vld [vmem:[%s6828_s7 + $0x228] ss:$16 sps:$4 sm:$0xff]   ;;  %v4988_v46 = vld [vmem:[%s6828_s7 + $0xc] ss:$16 sps:$4 sm:$0xff]  }
 0x2c1   : > { %v6037_v15 = vpack.c.bf16 %v1610_v49, %v1610_v49  ;;  %v6039_v22 = vpack.c.bf16 %v1612_v12, %v1612_v12  ;;  %3276 = vmatpush1.bf16.msra.mxu0 %v4890_v36  ;;  %3317 = vmatpush1.bf16.msra.mxu1 %v4893_v7  ;;  %v1601_v4 = vadd.f32 %v5848_v17, %v1536_v61  ;;  %v4941_v36 = vld [vmem:[%s6828_s7 + $0x700] ss:$16 sps:$4 sm:$0xff]   ;;  %v4946_v17 = vld [vmem:[%s6828_s7 + $0xec] ss:$16 sps:$4 sm:$0xff]   ;;  %v4947_v12 = vld [vmem:[%s6828_s7 + $0x2e8] ss:$16 sps:$4 sm:$0xff]  }
 0x2c2   : > { %3277 = vmatprep.subr.bf16.mxu0 %v4898_v48  ;;  %3318 = vmatprep.subr.bf16.mxu1 %v4901_v14  ;;  %v1603_v5 = vadd.f32 %v5851_v3, %v1548_v9  ;;  %v4949_v3 = vld [vmem:[%s6828_s7 + $0x2ec] ss:$16 sps:$4 sm:$0xff]   ;;  %v4992_v56 = vld [vmem:[%s6828_s7 + $0x1e8] ss:$16 sps:$4 sm:$0xff]  }
 0x2c3   : > { %3293 = vmatprep.mubr.bf16.mxu0 %v6037_v15  ;;  %3334 = vmatprep.mubr.bf16.mxu1 %v6039_v22  ;;  %v1609_v7 = vmax.f32 %v1601_v4, 0.0  ;;  %v4952_v14 = vld [vmem:[%s6828_s7 + $0xcc] ss:$16 sps:$4 sm:$0xff]   ;;  %v5001_v61 = vld [vmem:[%s6828_s7 + $0x3c8] ss:$16 sps:$4 sm:$0xff]  }
 0x2c4   : > { %v1611_v8 = vmax.f32 %v1603_v5, 0.0  ;;  %v4997_v55 = vld [vmem:[%s6828_s7 + $0x3ec] ss:$16 sps:$4 sm:$0xff]   ;;  %v5013_v4 = vld [vmem:[%s6828_s7 + $0x388] ss:$16 sps:$4 sm:$0xff]  }
 0x2c5   : > { %3278 = vmatpush2.bf16.msra.mxu0 %v4896_v53  ;;  %3319 = vmatpush2.bf16.msra.mxu1 %v4899_v59  ;;  %v6144_v48 = vpack.c.bf16 %v1609_v7, %v1609_v7  ;;  %v4955_v53 = vld [vmem:[%s6828_s7 + $0x2cc] ss:$16 sps:$4 sm:$0xff]   ;;  %v4950_v59 = vld [vmem:[%s6828_s7 + $0xc8] ss:$16 sps:$4 sm:$0xff]  }
 0x2c6   : > { %3279 = vmatprep.subr.bf16.mxu0 %v4904_v30  ;;  %3320 = vmatprep.subr.bf16.mxu1 %v4907_v31  ;;  %v6146_v49 = vpack.c.bf16 %v1611_v8, %v1611_v8  ;;  %v4956_v30 = vld [vmem:[%s6828_s7 + $0xa8] ss:$16 sps:$4 sm:$0xff]   ;;  %v4964_v31 = vld [vmem:[%s6828_s7 + $0x8c] ss:$16 sps:$4 sm:$0xff]  }
 0x2c7   : > { %v5006_v9 = vld [vmem:[%s6828_s7 + $0x1ac] ss:$16 sps:$4 sm:$0xff]   ;;  %v5019_v7 = vld [vmem:[%s6828_s7 + $0x368] ss:$16 sps:$4 sm:$0xff]  }
 0x2c8   : > { %v5018_v5 = vld [vmem:[%s6828_s7 + $0x16c] ss:$16 sps:$4 sm:$0xff]  }
 0x2c9   : > { %3280 = vmatpush2.bf16.msra.mxu0 %v4902_v32  ;;  %3321 = vmatpush2.bf16.msra.mxu1 %v4905_v37  ;;  %v4967_v32 = vld [vmem:[%s6828_s7 + $0x28c] ss:$16 sps:$4 sm:$0xff]   ;;  %v4962_v37 = vld [vmem:[%s6828_s7 + $0x88] ss:$16 sps:$4 sm:$0xff]  }
 0x2ca   : > { %3281 = vmatprep.subr.bf16.mxu0 %v4910_v33  ;;  %3322 = vmatprep.subr.bf16.mxu1 %v4913_v47  ;;  %v4973_v33 = vld [vmem:[%s6828_s7 + $0x26c] ss:$16 sps:$4 sm:$0xff]   ;;  %v4968_v47 = vld [vmem:[%s6828_s7 + $0x68] ss:$16 sps:$4 sm:$0xff]  }
 0x2cb   : > { %v5024_v8 = vld [vmem:[%s6828_s7 + $0x14c] ss:$16 sps:$4 sm:$0xff]  }
 0x2cd   : > { %3282 = vmatpush2.bf16.msra.mxu0 %v4908_v38  ;;  %3323 = vmatpush2.bf16.msra.mxu1 %v4911_v39  ;;  %v4971_v38 = vld [vmem:[%s6828_s7 + $0x268] ss:$16 sps:$4 sm:$0xff]   ;;  %v4976_v39 = vld [vmem:[%s6828_s7 + $0x4c] ss:$16 sps:$4 sm:$0xff]  }
 0x2ce   : > { %3283 = vmatprep.subr.bf16.mxu0 %v4916_v34  ;;  %3324 = vmatprep.subr.bf16.mxu1 %v4919_v41  ;;  %v4977_v34 = vld [vmem:[%s6828_s7 + $0x248] ss:$16 sps:$4 sm:$0xff]   ;;  %v4982_v41 = vld [vmem:[%s6828_s7 + $0x2c] ss:$16 sps:$4 sm:$0xff]  }
 0x2d1   : > { %3284 = vmatpush2.bf16.msra.mxu0 %v4914_v42  ;;  %3325 = vmatpush2.bf16.msra.mxu1 %v4917_v50  ;;  %v4985_v42 = vld [vmem:[%s6828_s7 + $0x22c] ss:$16 sps:$4 sm:$0xff]   ;;  %v4980_v50 = vld [vmem:[%s6828_s7 + $0x28] ss:$16 sps:$4 sm:$0xff]  }
 0x2d2   : > { %3285 = vmatprep.subr.bf16.mxu0 %v4922_v51  ;;  %3326 = vmatprep.subr.bf16.mxu1 %v4925_v0  ;;  %v4991_v51 = vld [vmem:[%s6828_s7 + $0x20c] ss:$16 sps:$4 sm:$0xff]   ;;  %v4986_v0 = vld [vmem:[%s6828_s7 + $0x8] ss:$16 sps:$4 sm:$0xff]  }
 0x2d5   : > { %3286 = vmatpush2.bf16.msra.mxu0 %v4920_v52  ;;  %3327 = vmatpush2.bf16.msra.mxu1 %v4923_v54  ;;  %v4989_v52 = vld [vmem:[%s6828_s7 + $0x208] ss:$16 sps:$4 sm:$0xff]   ;;  %v4994_v54 = vld [vmem:[%s6828_s7 + $0x1ec] ss:$16 sps:$4 sm:$0xff]  }
 0x2d6   : > { %3287 = vmatprep.subr.bf16.mxu0 %v4928_v57  ;;  %3328 = vmatprep.subr.bf16.mxu1 %v4931_v1  ;;  %v4995_v57 = vld [vmem:[%s6828_s7 + $0x3e8] ss:$16 sps:$4 sm:$0xff]   ;;  %v5000_v1 = vld [vmem:[%s6828_s7 + $0x1cc] ss:$16 sps:$4 sm:$0xff]  }
 0x2d9   : > { %3288 = vmatpush2.bf16.msra.mxu0 %v4926_v58  ;;  %3329 = vmatpush2.bf16.msra.mxu1 %v4929_v60  ;;  %v5003_v58 = vld [vmem:[%s6828_s7 + $0x3cc] ss:$16 sps:$4 sm:$0xff]   ;;  %v4998_v60 = vld [vmem:[%s6828_s7 + $0x1c8] ss:$16 sps:$4 sm:$0xff]  }
 0x2da   : > { %3289 = vmatprep.subr.bf16.mxu0 %v4934_v62  ;;  %3330 = vmatprep.subr.bf16.mxu1 %v4937_v63  ;;  %v5009_v62 = vld [vmem:[%s6828_s7 + $0x3ac] ss:$16 sps:$4 sm:$0xff]   ;;  %v5004_v63 = vld [vmem:[%s6828_s7 + $0x1a8] ss:$16 sps:$4 sm:$0xff]  }
 0x2dd   : > { %3290 = vmatpush2.bf16.msra.mxu0 %v4932_v10  ;;  %3331 = vmatpush2.bf16.msra.mxu1 %v4935_v16  ;;  %v5007_v10 = vld [vmem:[%s6828_s7 + $0x3a8] ss:$16 sps:$4 sm:$0xff]   ;;  %v5012_v16 = vld [vmem:[%s6828_s7 + $0x18c] ss:$16 sps:$4 sm:$0xff]  }
 0x2de   : > { %3291 = vmatprep.subr.bf16.mxu0 %v4940_v35  ;;  %3332 = vmatprep.subr.bf16.mxu1 %v4943_v2  ;;  %v5015_v35 = vld [vmem:[%s6828_s7 + $0x38c] ss:$16 sps:$4 sm:$0xff]   ;;  %v5010_v2 = vld [vmem:[%s6828_s7 + $0x188] ss:$16 sps:$4 sm:$0xff]  }
 0x2e1   : > { %3292 = vmatpush2.bf16.msra.mxu0 %v4938_v6  ;;  %3333 = vmatpush2.bf16.msra.mxu1 %v4941_v36  ;;  %v5021_v6 = vld [vmem:[%s6828_s7 + $0x36c] ss:$16 sps:$4 sm:$0xff]   ;;  %v5016_v36 = vld [vmem:[%s6828_s7 + $0x168] ss:$16 sps:$4 sm:$0xff]  }
 0x2e2   : > { %3343 = vmatprep.subr.bf16.mxu0 %v4946_v17  ;;  %3384 = vmatprep.subr.bf16.mxu1 %v4949_v3  ;;  %v5027_v17 = vld [vmem:[%s6828_s7 + $0x34c] ss:$16 sps:$4 sm:$0xff]   ;;  %v5022_v3 = vld [vmem:[%s6828_s7 + $0x148] ss:$16 sps:$4 sm:$0xff]  }
 0x2e4   : > { %3294 = vmatmul.mubr.bf16.vlgmr.msra.gmra.mxu0 %v6144_v48  ;;  %3335 = vmatmul.mubr.bf16.vlgmr.msra.gmra.mxu1 %v6146_v49 }
 0x2e5   : > { %3344 = vmatpush1.bf16.msra.mxu0 %v4944_v11  ;;  %3375 = vmatprep.mubr.bf16.mxu0 %v5895_v18  ;;  %v4961_v18 = vld [vmem:[%s6828_s7 + $0x2ac] ss:$16 sps:$4 sm:$0xff]   ;;  %v5025_v11 = vld [vmem:[%s6828_s7 + $0x348] ss:$16 sps:$4 sm:$0xff]  }
 0x2e6   : > { %3385 = vmatpush1.bf16.msra.mxu1 %v4947_v12  ;;  %3416 = vmatprep.mubr.bf16.mxu1 %v5897_v19  ;;  %v4959_v19 = vld [vmem:[%s6828_s7 + $0x2a8] ss:$16 sps:$4 sm:$0xff]   ;;  %v5030_v12 = vld [vmem:[%s6828_s7 + $0x12c] ss:$16 sps:$4 sm:$0xff]  }
 0x2e7   : > { %3345 = vmatprep.subr.bf16.mxu0 %v4952_v14  ;;  %3386 = vmatprep.subr.bf16.mxu1 %v4955_v53  ;;  %v5033_v14 = vld [vmem:[%s6828_s7 + $0x32c] ss:$16 sps:$4 sm:$0xff]   ;;  %v5028_v53 = vld [vmem:[%s6828_s7 + $0x128] ss:$16 sps:$4 sm:$0xff]  }
 0x2e9   : > { %3346 = vmatpush1.bf16.msra.mxu0 %v4950_v59  ;;  %v5031_v59 = vld [vmem:[%s6828_s7 + $0x328] ss:$16 sps:$4 sm:$0xff]  }
 0x2ea   : > { %3387 = vmatpush1.bf16.msra.mxu1 %v4953_v23  ;;  %3347 = vmatprep.subr.bf16.mxu0 %v4958_v29  ;;  %v5036_v23 = vld [vmem:[%s6828_s7 + $0x10c] ss:$16 sps:$4 sm:$0xff]  }
 0x2eb   : > { %3388 = vmatprep.subr.bf16.mxu1 %v4961_v18  ;;  %v5039_v29 = vld [vmem:[%s6828_s7 + $0x30c] ss:$16 sps:$4 sm:$0xff]   ;;  %v5034_v18 = vld [vmem:[%s6828_s7 + $0x108] ss:$16 sps:$4 sm:$0xff]  }
 0x2ed   : > { %3348 = vmatpush1.bf16.msra.mxu0 %v4956_v30  ;;  %v5037_v30 = vld [vmem:[%s6828_s7 + $0x308] ss:$16 sps:$4 sm:$0xff]  }
 0x2ee   : > { %3389 = vmatpush1.bf16.msra.mxu1 %v4959_v19  ;;  %3349 = vmatprep.subr.bf16.mxu0 %v4964_v31  ;;  %v5042_v19 = vld [vmem:[%s6828_s7 + $0x4ec] ss:$16 sps:$4 sm:$0xff]  }
 0x2ef   : > { %3390 = vmatprep.subr.bf16.mxu1 %v4967_v32  ;;  %v5045_v31 = vld [vmem:[%s6828_s7 + $0x6ec] ss:$16 sps:$4 sm:$0xff]   ;;  %v5040_v32 = vld [vmem:[%s6828_s7 + $0x4e8] ss:$16 sps:$4 sm:$0xff]  }
 0x2f1   : > { %3350 = vmatpush1.bf16.msra.mxu0 %v4962_v37  ;;  %v5043_v37 = vld [vmem:[%s6828_s7 + $0x6e8] ss:$16 sps:$4 sm:$0xff]  }
 0x2f2   : > { %3391 = vmatpush1.bf16.msra.mxu1 %v4965_v28  ;;  %3351 = vmatprep.subr.bf16.mxu0 %v4970_v20  ;;  %v5048_v28 = vld [vmem:[%s6828_s7 + $0x4cc] ss:$16 sps:$4 sm:$0xff]  }
 0x2f3   : > { %3392 = vmatprep.subr.bf16.mxu1 %v4973_v33  ;;  %v5051_v20 = vld [vmem:[%s6828_s7 + $0x6cc] ss:$16 sps:$4 sm:$0xff]   ;;  %v5046_v33 = vld [vmem:[%s6828_s7 + $0x4c8] ss:$16 sps:$4 sm:$0xff]  }
 0x2f5   : > { %3352 = vmatpush1.bf16.msra.mxu0 %v4968_v47  ;;  %v5049_v47 = vld [vmem:[%s6828_s7 + $0x6c8] ss:$16 sps:$4 sm:$0xff]  }
 0x2f6   : > { %3393 = vmatpush1.bf16.msra.mxu1 %v4971_v38  ;;  %3353 = vmatprep.subr.bf16.mxu0 %v4976_v39  ;;  %v5055_v38 = vld [vmem:[%s6828_s7 + $0x6a8] ss:$16 sps:$4 sm:$0xff]   ;;  %v5063_v39 = vld [vmem:[%s6828_s7 + $0x68c] ss:$16 sps:$4 sm:$0xff]  }
 0x2f7   : > { %3394 = vmatprep.subr.bf16.mxu1 %v4979_v40  ;;  %v5058_v40 = vld [vmem:[%s6828_s7 + $0x488] ss:$16 sps:$4 sm:$0xff]  }
 0x2f9   : > { %3354 = vmatpush1.bf16.msra.mxu0 %v4974_v21  ;;  %v5061_v21 = vld [vmem:[%s6828_s7 + $0x688] ss:$16 sps:$4 sm:$0xff]  }
 0x2fa   : > { %3395 = vmatpush1.bf16.msra.mxu1 %v4977_v34  ;;  %3355 = vmatprep.subr.bf16.mxu0 %v4982_v41  ;;  %v5066_v34 = vld [vmem:[%s6828_s7 + $0x46c] ss:$16 sps:$4 sm:$0xff]  }
 0x2fb   : > { %3396 = vmatprep.subr.bf16.mxu1 %v4985_v42  ;;  %v5069_v41 = vld [vmem:[%s6828_s7 + $0x66c] ss:$16 sps:$4 sm:$0xff]   ;;  %v5064_v42 = vld [vmem:[%s6828_s7 + $0x468] ss:$16 sps:$4 sm:$0xff]  }
 0x2fd   : > { %3356 = vmatpush1.bf16.msra.mxu0 %v4980_v50  ;;  %v5067_v50 = vld [vmem:[%s6828_s7 + $0x668] ss:$16 sps:$4 sm:$0xff]  }
 0x2fe   : > { %3397 = vmatpush1.bf16.msra.mxu1 %v4983_v45  ;;  %3357 = vmatprep.subr.bf16.mxu0 %v4988_v46  ;;  %v5072_v45 = vld [vmem:[%s6828_s7 + $0x44c] ss:$16 sps:$4 sm:$0xff]  }
 0x2ff   : > { %3398 = vmatprep.subr.bf16.mxu1 %v4991_v51  ;;  %v5075_v46 = vld [vmem:[%s6828_s7 + $0x64c] ss:$16 sps:$4 sm:$0xff]   ;;  %v5070_v51 = vld [vmem:[%s6828_s7 + $0x448] ss:$16 sps:$4 sm:$0xff]  }
 0x301   : > { %3358 = vmatpush1.bf16.msra.mxu0 %v4986_v0  ;;  %v5073_v0 = vld [vmem:[%s6828_s7 + $0x648] ss:$16 sps:$4 sm:$0xff]  }
 0x302   : > { %3399 = vmatpush1.bf16.msra.mxu1 %v4989_v52  ;;  %3359 = vmatprep.subr.bf16.mxu0 %v4994_v54  ;;  %v5078_v52 = vld [vmem:[%s6828_s7 + $0x42c] ss:$16 sps:$4 sm:$0xff]  }
 0x303   : > { %3400 = vmatprep.subr.bf16.mxu1 %v4997_v55  ;;  %v5081_v54 = vld [vmem:[%s6828_s7 + $0x62c] ss:$16 sps:$4 sm:$0xff]   ;;  %v5076_v55 = vld [vmem:[%s6828_s7 + $0x428] ss:$16 sps:$4 sm:$0xff]  }
 0x305   : > { %3360 = vmatpush2.bf16.msra.mxu0 %v4992_v56  ;;  %v5079_v56 = vld [vmem:[%s6828_s7 + $0x628] ss:$16 sps:$4 sm:$0xff]  }
 0x306   : > { %3401 = vmatpush2.bf16.msra.mxu1 %v4995_v57  ;;  %3361 = vmatprep.subr.bf16.mxu0 %v5000_v1  ;;  %v5084_v57 = vld [vmem:[%s6828_s7 + $0x40c] ss:$16 sps:$4 sm:$0xff]  }
 0x307   : > { %3402 = vmatprep.subr.bf16.mxu1 %v5003_v58  ;;  %v5087_v1 = vld [vmem:[%s6828_s7 + $0x60c] ss:$16 sps:$4 sm:$0xff]   ;;  %v5082_v58 = vld [vmem:[%s6828_s7 + $0x408] ss:$16 sps:$4 sm:$0xff]  }
 0x309   : > { %3362 = vmatpush2.bf16.msra.mxu0 %v4998_v60  ;;  %v5085_v60 = vld [vmem:[%s6828_s7 + $0x608] ss:$16 sps:$4 sm:$0xff]  }
 0x30a   : > { %3403 = vmatpush2.bf16.msra.mxu1 %v5001_v61  ;;  %3363 = vmatprep.subr.bf16.mxu0 %v5006_v9  ;;  %v5090_v61 = vld [vmem:[%s6828_s7 + $0x5ec] ss:$16 sps:$4 sm:$0xff]  }
 0x30b   : > { %3404 = vmatprep.subr.bf16.mxu1 %v5009_v62  ;;  %v5093_v9 = vld [vmem:[%s6828_s7 + $0x7ec] ss:$16 sps:$4 sm:$0xff]   ;;  %v5088_v62 = vld [vmem:[%s6828_s7 + $0x5e8] ss:$16 sps:$4 sm:$0xff]  }
 0x30d   : > { %3364 = vmatpush2.bf16.msra.mxu0 %v5004_v63  ;;  %v5091_v63 = vld [vmem:[%s6828_s7 + $0x7e8] ss:$16 sps:$4 sm:$0xff]  }
 0x30e   : > { %3405 = vmatpush2.bf16.msra.mxu1 %v5007_v10  ;;  %3365 = vmatprep.subr.bf16.mxu0 %v5012_v16  ;;  %v5096_v10 = vld [vmem:[%s6828_s7 + $0x5cc] ss:$16 sps:$4 sm:$0xff]  }
 0x30f   : > { %3406 = vmatprep.subr.bf16.mxu1 %v5015_v35  ;;  %v5099_v16 = vld [vmem:[%s6828_s7 + $0x7cc] ss:$16 sps:$4 sm:$0xff]   ;;  %v5094_v35 = vld [vmem:[%s6828_s7 + $0x5c8] ss:$16 sps:$4 sm:$0xff]  }
 0x311   : > { %3366 = vmatpush2.bf16.msra.mxu0 %v5010_v2  ;;  %v5097_v2 = vld [vmem:[%s6828_s7 + $0x7c8] ss:$16 sps:$4 sm:$0xff]  }
 0x312   : > { %3407 = vmatpush2.bf16.msra.mxu1 %v5013_v4  ;;  %3367 = vmatprep.subr.bf16.mxu0 %v5018_v5  ;;  %v5102_v4 = vld [vmem:[%s6828_s7 + $0x5ac] ss:$16 sps:$4 sm:$0xff]  }
 0x313   : > { %3408 = vmatprep.subr.bf16.mxu1 %v5021_v6  ;;  %v5105_v5 = vld [vmem:[%s6828_s7 + $0x7ac] ss:$16 sps:$4 sm:$0xff]   ;;  %v5100_v6 = vld [vmem:[%s6828_s7 + $0x5a8] ss:$16 sps:$4 sm:$0xff]  }
 0x315   : > { %3368 = vmatpush2.bf16.msra.mxu0 %v5016_v36  ;;  %v5103_v36 = vld [vmem:[%s6828_s7 + $0x7a8] ss:$16 sps:$4 sm:$0xff]  }
 0x316   : > { %3409 = vmatpush2.bf16.msra.mxu1 %v5019_v7  ;;  %3369 = vmatprep.subr.bf16.mxu0 %v5024_v8  ;;  %v5108_v7 = vld [vmem:[%s6828_s7 + $0x58c] ss:$16 sps:$4 sm:$0xff]  }
 0x317   : > { %3410 = vmatprep.subr.bf16.mxu1 %v5027_v17  ;;  %v5111_v8 = vld [vmem:[%s6828_s7 + $0x78c] ss:$16 sps:$4 sm:$0xff]   ;;  %v5106_v17 = vld [vmem:[%s6828_s7 + $0x588] ss:$16 sps:$4 sm:$0xff]  }
 0x319   : > { %3370 = vmatpush2.bf16.msra.mxu0 %v5022_v3  ;;  %v5109_v3 = vld [vmem:[%s6828_s7 + $0x788] ss:$16 sps:$4 sm:$0xff]  }
 0x31a   : > { %3411 = vmatpush2.bf16.msra.mxu1 %v5025_v11  ;;  %3371 = vmatprep.subr.bf16.mxu0 %v5030_v12  ;;  %v5114_v11 = vld [vmem:[%s6828_s7 + $0x56c] ss:$16 sps:$4 sm:$0xff]  }
 0x31b   : > { %3412 = vmatprep.subr.bf16.mxu1 %v5033_v14  ;;  %v5117_v12 = vld [vmem:[%s6828_s7 + $0x76c] ss:$16 sps:$4 sm:$0xff]   ;;  %v5112_v14 = vld [vmem:[%s6828_s7 + $0x568] ss:$16 sps:$4 sm:$0xff]  }
 0x31d   : > { %3372 = vmatpush2.bf16.msra.mxu0 %v5028_v53  ;;  %v5115_v53 = vld [vmem:[%s6828_s7 + $0x768] ss:$16 sps:$4 sm:$0xff]  }
 0x31e   : > { %3413 = vmatpush2.bf16.msra.mxu1 %v5031_v59  ;;  %3373 = vmatprep.subr.bf16.mxu0 %v5036_v23  ;;  %v5120_v59 = vld [vmem:[%s6828_s7 + $0x54c] ss:$16 sps:$4 sm:$0xff]  }
 0x31f   : > { %3414 = vmatprep.subr.bf16.mxu1 %v5039_v29  ;;  %v5123_v23 = vld [vmem:[%s6828_s7 + $0x74c] ss:$16 sps:$4 sm:$0xff]   ;;  %v5118_v29 = vld [vmem:[%s6828_s7 + $0x548] ss:$16 sps:$4 sm:$0xff]  }
 0x321   : > { %3374 = vmatpush2.bf16.msra.mxu0 %v5034_v18  ;;  %v5121_v18 = vld [vmem:[%s6828_s7 + $0x748] ss:$16 sps:$4 sm:$0xff]  }
 0x322   : > { %3415 = vmatpush2.bf16.msra.mxu1 %v5037_v30  ;;  %3425 = vmatprep.subr.bf16.mxu0 %v5042_v19  ;;  %v5126_v30 = vld [vmem:[%s6828_s7 + $0x52c] ss:$16 sps:$4 sm:$0xff]  }
 0x323   : > { %3466 = vmatprep.subr.bf16.mxu1 %v5045_v31  ;;  %v5129_v19 = vld [vmem:[%s6828_s7 + $0x72c] ss:$16 sps:$4 sm:$0xff]   ;;  %v5124_v31 = vld [vmem:[%s6828_s7 + $0x528] ss:$16 sps:$4 sm:$0xff]  }
 0x324   : > { %3376 = vmatmul.mubr.bf16.vlgmr.msra.gmra.mxu0 %v5905_v24  ;;  %v5054_v24 = vld [vmem:[%s6828_s7 + $0x4ac] ss:$16 sps:$4 sm:$0xff]  }
 0x325   : > { %3417 = vmatmul.mubr.bf16.vlgmr.msra.gmra.mxu1 %v5907_v25  ;;  %3426 = vmatpush1.bf16.msra.mxu0 %v5040_v32  ;;  %v5057_v25 = vld [vmem:[%s6828_s7 + $0x6ac] ss:$16 sps:$4 sm:$0xff]   ;;  %v5127_v32 = vld [vmem:[%s6828_s7 + $0x728] ss:$16 sps:$4 sm:$0xff]  }
 0x326   : > { %3457 = vmatprep.mubr.bf16.mxu0 %v6037_v15  ;;  %3467 = vmatpush1.bf16.msra.mxu1 %v5043_v37  ;;  %v5052_v15 = vld [vmem:[%s6828_s7 + $0x4a8] ss:$16 sps:$4 sm:$0xff]   ;;  %v5132_v37 = vld [vmem:[%s6828_s7 + $0x50c] ss:$16 sps:$4 sm:$0xff]  }
 0x327   : > { %3498 = vmatprep.mubr.bf16.mxu1 %v6039_v22  ;;  %3427 = vmatprep.subr.bf16.mxu0 %v5048_v28  ;;  %v5060_v22 = vld [vmem:[%s6828_s7 + $0x48c] ss:$16 sps:$4 sm:$0xff]  }
 0x328   : > { %3468 = vmatprep.subr.bf16.mxu1 %v5051_v20  ;;  %v5135_v28 = vld [vmem:[%s6828_s7 + $0x70c] ss:$16 sps:$4 sm:$0xff]   ;;  %v5130_v20 = vld [vmem:[%s6828_s7 + $0x508] ss:$16 sps:$4 sm:$0xff]  }
 0x329   : > { %3428 = vmatpush1.bf16.msra.mxu0 %v5046_v33  ;;  %v5133_v33 = vld [vmem:[%s6828_s7 + $0x708] ss:$16 sps:$4 sm:$0xff]  }
 0x32a   : > { %3469 = vmatpush1.bf16.msra.mxu1 %v5049_v47  ;;  %3429 = vmatprep.subr.bf16.mxu0 %v5054_v24  ;;  %v5138_v47 = vld [vmem:[%s6830_s9 + $0x74] ss:$8 sps:$4 sm:$0xff]   ;;  %v5136_v24 = vld [vmem:[%s6830_s9 + $0x70] ss:$8 sps:$4 sm:$0xff]  }
 0x32b   : > { %3470 = vmatprep.subr.bf16.mxu1 %v5057_v25  ;;  %v5141_v25 = vld [vmem:[%s6830_s9 + $0x64] ss:$8 sps:$4 sm:$0xff]  }
 0x32d   : > { %3430 = vmatpush1.bf16.msra.mxu0 %v5052_v15 }
 0x32e   : > { %3471 = vmatpush1.bf16.msra.mxu1 %v5055_v38  ;;  %3431 = vmatprep.subr.bf16.mxu0 %v5060_v22  ;;  %v5139_v22 = vld [vmem:[%s6830_s9 + $0x60] ss:$8 sps:$4 sm:$0xff]  }
 0x32f   : > { %3472 = vmatprep.subr.bf16.mxu1 %v5063_v39 }
 0x331   : > { %3432 = vmatpush1.bf16.msra.mxu0 %v5058_v40 }
 0x332   : > { %3473 = vmatpush1.bf16.msra.mxu1 %v5061_v21  ;;  %3433 = vmatprep.subr.bf16.mxu0 %v5066_v34 }
 0x333   : > { %3474 = vmatprep.subr.bf16.mxu1 %v5069_v41 }
 0x335   : > { %3434 = vmatpush1.bf16.msra.mxu0 %v5064_v42 }
 0x336   : > { %3475 = vmatpush1.bf16.msra.mxu1 %v5067_v50  ;;  %3435 = vmatprep.subr.bf16.mxu0 %v5072_v45  ;;  %v5147_v50 = vld [vmem:[%s6830_s9 + $0x44] ss:$8 sps:$4 sm:$0xff]   ;;  %v5184_v45 = vld [vmem:[%s6830_s9 + $0x170] ss:$8 sps:$4 sm:$0xff]  }
 0x337   : > { %3476 = vmatprep.subr.bf16.mxu1 %v5075_v46  ;;  %v5186_v46 = vld [vmem:[%s6830_s9 + $0x174] ss:$8 sps:$4 sm:$0xff]  }
 0x339   : > { %3436 = vmatpush1.bf16.msra.mxu0 %v5070_v51  ;;  %v5189_v51 = vld [vmem:[%s6830_s9 + $0x164] ss:$8 sps:$4 sm:$0xff]  }
 0x33a   : > { %3477 = vmatpush1.bf16.msra.mxu1 %v5073_v0  ;;  %3437 = vmatprep.subr.bf16.mxu0 %v5078_v52  ;;  %v5145_v0 = vld [vmem:[%s6830_s9 + $0x40] ss:$8 sps:$4 sm:$0xff]   ;;  %v5150_v52 = vld [vmem:[%s6830_s9 + $0x34] ss:$8 sps:$4 sm:$0xff]  }
 0x33b   : > { %3478 = vmatprep.subr.bf16.mxu1 %v5081_v54  ;;  %v5187_v54 = vld [vmem:[%s6830_s9 + $0x160] ss:$8 sps:$4 sm:$0xff]  }
 0x33d   : > { %3438 = vmatpush1.bf16.msra.mxu0 %v5076_v55  ;;  %v5192_v55 = vld [vmem:[%s6830_s9 + $0x154] ss:$8 sps:$4 sm:$0xff]  }
 0x33e   : > { %3479 = vmatpush1.bf16.msra.mxu1 %v5079_v56  ;;  %3439 = vmatprep.subr.bf16.mxu0 %v5084_v57  ;;  %v5148_v56 = vld [vmem:[%s6830_s9 + $0x30] ss:$8 sps:$4 sm:$0xff]   ;;  %v5153_v57 = vld [vmem:[%s6830_s9 + $0x24] ss:$8 sps:$4 sm:$0xff]  }
 0x33f   : > { %3480 = vmatprep.subr.bf16.mxu1 %v5087_v1  ;;  %v5190_v1 = vld [vmem:[%s6830_s9 + $0x150] ss:$8 sps:$4 sm:$0xff]  }
 0x341   : > { %3440 = vmatpush1.bf16.msra.mxu0 %v5082_v58  ;;  %v5195_v58 = vld [vmem:[%s6830_s9 + $0x144] ss:$8 sps:$4 sm:$0xff]  }
 0x342   : > { %3481 = vmatpush1.bf16.msra.mxu1 %v5085_v60  ;;  %3441 = vmatprep.subr.bf16.mxu0 %v5090_v61  ;;  %v5151_v60 = vld [vmem:[%s6830_s9 + $0x20] ss:$8 sps:$4 sm:$0xff]   ;;  %v5156_v61 = vld [vmem:[%s6830_s9 + $0x14] ss:$8 sps:$4 sm:$0xff]  }
 0x343   : > { %3482 = vmatprep.subr.bf16.mxu1 %v5093_v9  ;;  %v5193_v9 = vld [vmem:[%s6830_s9 + $0x140] ss:$8 sps:$4 sm:$0xff]  }
 0x345   : > { %3442 = vmatpush2.bf16.msra.mxu0 %v5088_v62  ;;  %v5198_v62 = vld [vmem:[%s6830_s9 + $0x134] ss:$8 sps:$4 sm:$0xff]  }
 0x346   : > { %3483 = vmatpush2.bf16.msra.mxu1 %v5091_v63  ;;  %3443 = vmatprep.subr.bf16.mxu0 %v5096_v10  ;;  %v5154_v63 = vld [vmem:[%s6830_s9 + $0x10] ss:$8 sps:$4 sm:$0xff]   ;;  %v5159_v10 = vld [vmem:[%s6830_s9 + $0x4] ss:$8 sps:$4 sm:$0xff]  }
 0x347   : > { %3484 = vmatprep.subr.bf16.mxu1 %v5099_v16  ;;  %v5196_v16 = vld [vmem:[%s6830_s9 + $0x130] ss:$8 sps:$4 sm:$0xff]  }
 0x349   : > { %3444 = vmatpush2.bf16.msra.mxu0 %v5094_v35  ;;  %v5201_v35 = vld [vmem:[%s6830_s9 + $0x124] ss:$8 sps:$4 sm:$0xff]  }
 0x34a   : > { %3485 = vmatpush2.bf16.msra.mxu1 %v5097_v2  ;;  %3445 = vmatprep.subr.bf16.mxu0 %v5102_v4  ;;  %v5157_v2 = vld [vmem:[%s6830_s9] ss:$8 sps:$4 sm:$0xff]   ;;  %v5162_v4 = vld [vmem:[%s6830_s9 + $0xf4] ss:$8 sps:$4 sm:$0xff]  }
 0x34b   : > { %3486 = vmatprep.subr.bf16.mxu1 %v5105_v5  ;;  %v5199_v5 = vld [vmem:[%s6830_s9 + $0x120] ss:$8 sps:$4 sm:$0xff]  }
 0x34d   : > { %3446 = vmatpush2.bf16.msra.mxu0 %v5100_v6  ;;  %v5204_v6 = vld [vmem:[%s6830_s9 + $0x114] ss:$8 sps:$4 sm:$0xff]  }
 0x34e   : > { %3487 = vmatpush2.bf16.msra.mxu1 %v5103_v36  ;;  %3447 = vmatprep.subr.bf16.mxu0 %v5108_v7  ;;  %v5160_v36 = vld [vmem:[%s6830_s9 + $0xf0] ss:$8 sps:$4 sm:$0xff]   ;;  %v5165_v7 = vld [vmem:[%s6830_s9 + $0xe4] ss:$8 sps:$4 sm:$0xff]  }
 0x34f   : > { %3488 = vmatprep.subr.bf16.mxu1 %v5111_v8  ;;  %v5202_v8 = vld [vmem:[%s6830_s9 + $0x110] ss:$8 sps:$4 sm:$0xff]  }
 0x351   : > { %3448 = vmatpush2.bf16.msra.mxu0 %v5106_v17  ;;  %v5207_v17 = vld [vmem:[%s6830_s9 + $0x104] ss:$8 sps:$4 sm:$0xff]  }
 0x352   : > { %3489 = vmatpush2.bf16.msra.mxu1 %v5109_v3  ;;  %3449 = vmatprep.subr.bf16.mxu0 %v5114_v11  ;;  %v5163_v3 = vld [vmem:[%s6830_s9 + $0xe0] ss:$8 sps:$4 sm:$0xff]   ;;  %v5168_v11 = vld [vmem:[%s6830_s9 + $0xd4] ss:$8 sps:$4 sm:$0xff]  }
 0x353   : > { %3490 = vmatprep.subr.bf16.mxu1 %v5117_v12  ;;  %v5205_v12 = vld [vmem:[%s6830_s9 + $0x100] ss:$8 sps:$4 sm:$0xff]  }
 0x355   : > { %3450 = vmatpush2.bf16.msra.mxu0 %v5112_v14  ;;  %v5210_v14 = vld [vmem:[%s6830_s9 + $0x1f4] ss:$8 sps:$4 sm:$0xff]  }
 0x356   : > { %3491 = vmatpush2.bf16.msra.mxu1 %v5115_v53  ;;  %3451 = vmatprep.subr.bf16.mxu0 %v5120_v59  ;;  %v5166_v53 = vld [vmem:[%s6830_s9 + $0xd0] ss:$8 sps:$4 sm:$0xff]   ;;  %v5171_v59 = vld [vmem:[%s6830_s9 + $0xc4] ss:$8 sps:$4 sm:$0xff]  }
 0x357   : > { %3492 = vmatprep.subr.bf16.mxu1 %v5123_v23  ;;  %v5208_v23 = vld [vmem:[%s6830_s9 + $0x1f0] ss:$8 sps:$4 sm:$0xff]  }
 0x359   : > { %3452 = vmatpush2.bf16.msra.mxu0 %v5118_v29  ;;  %v5213_v29 = vld [vmem:[%s6830_s9 + $0x1e4] ss:$8 sps:$4 sm:$0xff]  }
 0x35a   : > { %3493 = vmatpush2.bf16.msra.mxu1 %v5121_v18  ;;  %3453 = vmatprep.subr.bf16.mxu0 %v5126_v30  ;;  %v5169_v18 = vld [vmem:[%s6830_s9 + $0xc0] ss:$8 sps:$4 sm:$0xff]   ;;  %v5174_v30 = vld [vmem:[%s6830_s9 + $0xb4] ss:$8 sps:$4 sm:$0xff]  }
 0x35b   : > { %3494 = vmatprep.subr.bf16.mxu1 %v5129_v19  ;;  %v5211_v19 = vld [vmem:[%s6830_s9 + $0x1e0] ss:$8 sps:$4 sm:$0xff]  }
 0x35d   : > { %3454 = vmatpush2.bf16.msra.mxu0 %v5124_v31  ;;  %v5216_v31 = vld [vmem:[%s6830_s9 + $0x1d4] ss:$8 sps:$4 sm:$0xff]  }
 0x35e   : > { %3495 = vmatpush2.bf16.msra.mxu1 %v5127_v32  ;;  %3455 = vmatprep.subr.bf16.mxu0 %v5132_v37  ;;  %v5172_v32 = vld [vmem:[%s6830_s9 + $0xb0] ss:$8 sps:$4 sm:$0xff]   ;;  %v5177_v37 = vld [vmem:[%s6830_s9 + $0xa4] ss:$8 sps:$4 sm:$0xff]  }
 0x35f   : > { %3496 = vmatprep.subr.bf16.mxu1 %v5135_v28  ;;  %v5214_v28 = vld [vmem:[%s6830_s9 + $0x1d0] ss:$8 sps:$4 sm:$0xff]  }
 0x361   : > { %3456 = vmatpush2.bf16.msra.mxu0 %v5130_v20  ;;  %v5219_v20 = vld [vmem:[%s6830_s9 + $0x1c4] ss:$8 sps:$4 sm:$0xff]  }
 0x362   : > { %3497 = vmatpush2.bf16.msra.mxu1 %v5133_v33  ;;  %3911 = vmatprep.subr.bf16.mxu0 %v5138_v47  ;;  %v5175_v33 = vld [vmem:[%s6830_s9 + $0xa0] ss:$8 sps:$4 sm:$0xff]   ;;  %v5180_v47 = vld [vmem:[%s6830_s9 + $0x94] ss:$8 sps:$4 sm:$0xff]  }
 0x363   : > { %3952 = vmatprep.subr.bf16.mxu1 %v5186_v46 }
 0x364   : > { %3458 = vmatmul.mubr.bf16.vlgmr.msra.gmra.mxu0 %v6144_v48  ;;  %v6541_v15 = vpop.f32.mrf.mxu0  ;;  %v6543_v38 = vpop.f32.mrf.mxu1  ;;  %v5144_v48 = vld [vmem:[%s6830_s9 + $0x54] ss:$8 sps:$4 sm:$0xff]  }
 0x365   : > { %3499 = vmatmul.mubr.bf16.vlgmr.msra.gmra.mxu1 %v6146_v49  ;;  %3912 = vmatpush1.bf16.msra.mxu0 %v5136_v24  ;;  %v5142_v49 = vld [vmem:[%s6830_s9 + $0x50] ss:$8 sps:$4 sm:$0xff]   ;;  %v5217_v24 = vld [vmem:[%s6830_s9 + $0x1c0] ss:$8 sps:$4 sm:$0xff]  }
 0x366   : > { %v6549_v39 = vpop.f32.mrf.mxu0  ;;  %v6551_v40 = vpop.f32.mrf.mxu1  ;;  %3913 = vmatprep.subr.bf16.mxu0 %v5141_v25  ;;  %3953 = vmatpush1.bf16.msra.mxu1 %v5184_v45  ;;  %v5222_v25 = vld [vmem:[%s6830_s9 + $0x1b4] ss:$8 sps:$4 sm:$0xff]  }
 0x367   : > { %3954 = vmatprep.subr.bf16.mxu1 %v5189_v51 }
 0x368   : > { %v3217_v21 = vpop.f32.mrf.mxu0  ;;  %v3258_v34 = vpop.f32.mrf.mxu1 }
 0x369   : > { %3914 = vmatpush1.bf16.msra.mxu0 %v5139_v22  ;;  %v6706_v22 = vld [vmem:[%s6829_s8] sm:$0xf]  ;;  %v5183_v21 = vld [vmem:[%s6830_s9 + $0x84] ss:$8 sps:$4 sm:$0xff]   ;;  %v5220_v34 = vld [vmem:[%s6830_s9 + $0x1b0] ss:$8 sps:$4 sm:$0xff]  }
 0x36a   : > { %v3218_v41 = vpop.f32.mrf.mxu0  ;;  %v3259_v42 = vpop.f32.mrf.mxu1  ;;  %3915 = vmatprep.subr.bf16.mxu0 %v5144_v48  ;;  %3955 = vmatpush1.bf16.msra.mxu1 %v5187_v54  ;;  %v5178_v48 = vld [vmem:[%s6830_s9 + $0x90] ss:$8 sps:$4 sm:$0xff]  }
 0x36b   : > { %3956 = vmatprep.subr.bf16.mxu1 %v5192_v55  ;;  %v3166_v41 = vrot.slane %v6706_v22, %v5875_v43  ;;  %v5181_v42 = vld [vmem:[%s6830_s9 + $0x80] ss:$8 sps:$4 sm:$0xff]  }
 0x36d   : > { %3916 = vmatpush1.bf16.msra.mxu0 %v5142_v49  ;;  %v3162_v49 = vrot.slane %v6706_v22, %v5858_v26  ;;  %v3216_v45 = vadd.f32 %v6549_v39, %v3166_v41 }
 0x36e   : > { %3917 = vmatprep.subr.bf16.mxu0 %v5147_v50  ;;  %3957 = vmatpush1.bf16.msra.mxu1 %v5190_v1 }
 0x36f   : > { %3958 = vmatprep.subr.bf16.mxu1 %v5195_v58  ;;  %v3214_v50 = vadd.f32 %v6541_v15, %v3162_v49  ;;  %v3257_v54 = vadd.f32 %v6551_v40, %v3216_v45  ;;  %v5226_v40 = vld [vmem:[%s6830_s9 + $0x190] ss:$8 sps:$4 sm:$0xff]  }
 0x371   : > { %3918 = vmatpush1.bf16.msra.mxu0 %v5145_v0  ;;  %v3255_v46 = vadd.f32 %v6543_v38, %v3214_v50 }
 0x372   : > { %3919 = vmatprep.subr.bf16.mxu0 %v5150_v52  ;;  %3959 = vmatpush1.bf16.msra.mxu1 %v5193_v9  ;;  %v5225_v52 = vld [vmem:[%s6830_s9 + $0x1a4] ss:$8 sps:$4 sm:$0xff]  }
 0x373   : > { %3960 = vmatprep.subr.bf16.mxu1 %v5198_v62 }
 0x375   : > { %3920 = vmatpush1.bf16.msra.mxu0 %v5148_v56  ;;  %v5223_v56 = vld [vmem:[%s6830_s9 + $0x1a0] ss:$8 sps:$4 sm:$0xff]  }
 0x376   : > { %3921 = vmatprep.subr.bf16.mxu0 %v5153_v57  ;;  %3961 = vmatpush1.bf16.msra.mxu1 %v5196_v16  ;;  %v5231_v16 = vld [vmem:[%s6830_s9 + $0x184] ss:$8 sps:$4 sm:$0xff]  }
 0x377   : > { %3962 = vmatprep.subr.bf16.mxu1 %v5201_v35 }
 0x379   : > { %3922 = vmatpush1.bf16.msra.mxu0 %v5151_v60  ;;  %v5228_v60 = vld [vmem:[%s6830_s9 + $0x194] ss:$8 sps:$4 sm:$0xff]  }
 0x37a   : > { %3923 = vmatprep.subr.bf16.mxu0 %v5156_v61  ;;  %3963 = vmatpush1.bf16.msra.mxu1 %v5199_v5 }
 0x37b   : > { %3964 = vmatprep.subr.bf16.mxu1 %v5204_v6 }
 0x37d   : > { %3924 = vmatpush1.bf16.msra.mxu0 %v5154_v63 }
 0x37e   : > { %3925 = vmatprep.subr.bf16.mxu0 %v5159_v10  ;;  %3965 = vmatpush1.bf16.msra.mxu1 %v5202_v8 }
 0x37f   : > { %3966 = vmatprep.subr.bf16.mxu1 %v5207_v17 }
 0x381   : > { %3926 = vmatpush1.bf16.msra.mxu0 %v5157_v2  ;;  %v5229_v2 = vld [vmem:[%s6830_s9 + $0x180] ss:$8 sps:$4 sm:$0xff]  }
 0x382   : > { %3927 = vmatprep.subr.bf16.mxu0 %v5162_v4  ;;  %3967 = vmatpush1.bf16.msra.mxu1 %v5205_v12  ;;  %v5232_v12 = vld [vmem:[%s6832_s11 + $0x78] sm:$0xff]  }
 0x383   : > { %3968 = vmatprep.subr.bf16.mxu1 %v5210_v14  ;;  %v5233_v14 = vld [vmem:[%s6832_s11 + $0x38] sm:$0xff]  }
 0x385   : > { %3928 = vmatpush2.bf16.msra.mxu0 %v5160_v36 }
 0x386   : > { %3929 = vmatprep.subr.bf16.mxu0 %v5165_v7  ;;  %3969 = vmatpush2.bf16.msra.mxu1 %v5208_v23  ;;  %v5236_v23 = vld [vmem:[%s6832_s11 + $0x68] sm:$0xff]  }
 0x387   : > { %3970 = vmatprep.subr.bf16.mxu1 %v5213_v29  ;;  %v5237_v29 = vld [vmem:[%s6832_s11 + $0x28] sm:$0xff]  }
 0x389   : > { %3930 = vmatpush2.bf16.msra.mxu0 %v5163_v3 }
 0x38a   : > { %3931 = vmatprep.subr.bf16.mxu0 %v5168_v11  ;;  %3971 = vmatpush2.bf16.msra.mxu1 %v5211_v19  ;;  %v5240_v19 = vld [vmem:[%s6832_s11 + $0x58] sm:$0xff]  }
 0x38b   : > { %3972 = vmatprep.subr.bf16.mxu1 %v5216_v31  ;;  %v5241_v31 = vld [vmem:[%s6832_s11 + $0x18] sm:$0xff]  }
 0x38d   : > { %3932 = vmatpush2.bf16.msra.mxu0 %v5166_v53  ;;  %v5234_v53 = vld [vmem:[%s6832_s11 + $0x70] sm:$0xff]  }
 0x38e   : > { %3933 = vmatprep.subr.bf16.mxu0 %v5171_v59  ;;  %3973 = vmatpush2.bf16.msra.mxu1 %v5214_v28  ;;  %v5235_v59 = vld [vmem:[%s6832_s11 + $0x30] sm:$0xff]   ;;  %v3170_v28 = vrot.slane %v6706_v22, %v1567_v27 }
 0x38f   : > { %3974 = vmatprep.subr.bf16.mxu1 %v5219_v20  ;;  %v3174_v20 = vrot.slane %v6706_v22, %v1571_v44 }
 0x391   : > { %3934 = vmatpush2.bf16.msra.mxu0 %v5169_v18  ;;  %v5238_v18 = vld [vmem:[%s6832_s11 + $0x60] sm:$0xff]  }
 0x392   : > { %3935 = vmatprep.subr.bf16.mxu0 %v5174_v30  ;;  %3975 = vmatpush2.bf16.msra.mxu1 %v5217_v24  ;;  %v5239_v30 = vld [vmem:[%s6832_s11 + $0x20] sm:$0xff]  }
 0x393   : > { %3976 = vmatprep.subr.bf16.mxu1 %v5222_v25 }
 0x395   : > { %3936 = vmatpush2.bf16.msra.mxu0 %v5172_v32  ;;  %v5242_v32 = vld [vmem:[%s6832_s11 + $0x50] sm:$0xff]  }
 0x396   : > { %3937 = vmatprep.subr.bf16.mxu0 %v5177_v37  ;;  %3977 = vmatpush2.bf16.msra.mxu1 %v5220_v34  ;;  %v5243_v37 = vld [vmem:[%s6832_s11 + $0x10] sm:$0xff]  }
 0x397   : > { %3978 = vmatprep.subr.bf16.mxu1 %v5225_v52 }
 0x399   : > { %3938 = vmatpush2.bf16.msra.mxu0 %v5175_v33 }
 0x39a   : > { %3939 = vmatprep.subr.bf16.mxu0 %v5180_v47  ;;  %3979 = vmatpush2.bf16.msra.mxu1 %v5223_v56  ;;  %v5244_v56 = vld [vmem:[%s6832_s11 + $0x48] sm:$0xff]  }
 0x39b   : > { %3980 = vmatprep.subr.bf16.mxu1 %v5228_v60 }
 0x39d   : > { %3940 = vmatpush2.bf16.msra.mxu0 %v5178_v48 }
 0x39e   : > { %3941 = vmatprep.subr.bf16.mxu0 %v5183_v21  ;;  %3981 = vmatpush2.bf16.msra.mxu1 %v5226_v40 }
 0x39f   : > { %3982 = vmatprep.subr.bf16.mxu1 %v5231_v16 }
 0x3a1   : > { %3942 = vmatpush2.bf16.msra.mxu0 %v5181_v42 }
 0x3a2   : > { %3983 = vmatpush2.bf16.msra.mxu1 %v5229_v2  ;;  %4670 = vmatprep.subr.bf16.mxu0 %v5232_v12 }
 0x3a4   : > { %v3295_v51 = vpop.f32.mrf.mxu0  ;;  %v3336_v0 = vpop.f32.mrf.mxu1 }
 0x3a5   : > { %v3296_v55 = vadd.f32 %v3295_v51, %v3255_v46 }
 0x3a6   : > { %v3297_v57 = vpop.f32.mrf.mxu0  ;;  %v3338_v15 = vpop.f32.mrf.mxu1 }
 0x3a7   : > { %v3337_v39 = vadd.f32 %v3336_v0, %v3296_v55  ;;  %v3298_v1 = vadd.f32 %v3297_v57, %v3257_v54  ;;  %v5245_v57 = vld [vmem:[%s6832_s11 + $0x8] sm:$0xff]  }
 0x3a8   : > { %v3299_v38 = vpop.f32.mrf.mxu0  ;;  %v3340_v58 = vpop.f32.mrf.mxu1 }
 0x3a9   : > { %v3339_v61 = vadd.f32 %v3338_v15, %v3298_v1  ;;  %v3507_v9 = vmax.f32 %v3337_v39, 0.0  ;;  %v5246_v1 = vld [vmem:[%s6832_s11 + $0x40] sm:$0xff]  }
 0x3aa   : > { %v3300_v62 = vpop.f32.mrf.mxu0  ;;  %v3341_v63 = vpop.f32.mrf.mxu1  ;;  %v5247_v38 = vld [vmem:[%s6832_s11] sm:$0xff]  }
 0x3ab   : > { %v3508_v10 = vmax.f32 %v3339_v61, 0.0  ;;  %v3511_v4 = vpack.c.bf16 %v3507_v9, %v3507_v9  ;;  %v3579_v58 = vld [vmem:[%s6831_s10] sm:$0x3] }
 0x3ac   : > { %v3904_v60 = vrot.slane %v3579_v58, %v5858_v26  ;;  %v3908_v61 = vrot.slane %v3579_v58, %v5875_v43  ;;  %v4029_v26 = vld [vmem:[%s6833_s12] sm:$0x1] }
 0x3ad   : > { %v3512_v35 = vpack.c.bf16 %v3508_v10, %v3508_v10 }
 0x3af   : > { %3943 = vmatprep.mubr.bf16.mxu0 %v3512_v35 }
 0x3b0   : > { %3944 = vmatmul.mubr.bf16.vlgmr.msra.gmra.mxu0 %v3511_v4 }
 0x3b1   : > { %4671 = vmatpush3.bf16.msra.mxu0 %v5233_v14 }
 0x3b2   : > { %4672 = vmatprep.subr.bf16.mxu0 %v5234_v53 }
 0x3b5   : > { %4673 = vmatpush3.bf16.msra.mxu0 %v5235_v59 }
 0x3b6   : > { %4674 = vmatprep.subr.bf16.mxu0 %v5236_v23 }
 0x3b9   : > { %4675 = vmatpush3.bf16.msra.mxu0 %v5237_v29 }
 0x3ba   : > { %4676 = vmatprep.subr.bf16.mxu0 %v5238_v18 }
 0x3bd   : > { %4677 = vmatpush3.bf16.msra.mxu0 %v5239_v30 }
 0x3be   : > { %4678 = vmatprep.subr.bf16.mxu0 %v5240_v19 }
 0x3c1   : > { %4679 = vmatpush3.bf16.msra.mxu0 %v5241_v31 }
 0x3c2   : > { %4680 = vmatprep.subr.bf16.mxu0 %v5242_v32 }
 0x3c5   : > { %4681 = vmatpush3.bf16.msra.mxu0 %v5243_v37 }
 0x3c6   : > { %4682 = vmatprep.subr.bf16.mxu0 %v5244_v56 }
 0x3c9   : > { %4683 = vmatpush3.bf16.msra.mxu0 %v5245_v57 }
 0x3ca   : > { %4684 = vmatprep.subr.bf16.mxu0 %v5246_v1 }
 0x3cd   : > { %4685 = vmatpush3.bf16.msra.mxu0 %v5247_v38 }
 0x3e4   : > { %v3377_v5 = vpop.f32.mrf.mxu0 }
 0x3e5   : > { %v3418_v6 = vpop.f32.mrf.mxu1  ;;  %v3378_v33 = vadd.f32 %v3377_v5, %v3170_v28 }
 0x3e6   : > { %v3379_v36 = vpop.f32.mrf.mxu0 }
 0x3e7   : > { %v3420_v7 = vpop.f32.mrf.mxu1  ;;  %v3380_v47 = vadd.f32 %v3379_v36, %v3174_v20  ;;  %v3419_v24 = vadd.f32 %v3418_v6, %v3378_v33 }
 0x3e8   : > { %v3381_v8 = vpop.f32.mrf.mxu0 }
 0x3e9   : > { %v3422_v17 = vpop.f32.mrf.mxu1  ;;  %v3421_v48 = vadd.f32 %v3420_v7, %v3380_v47 }
 0x3ea   : > { %v3382_v3 = vpop.f32.mrf.mxu0 }
 0x3eb   : > { %v3423_v11 = vpop.f32.mrf.mxu1 }
 0x424   : > { %v3459_v25 = vpop.f32.mrf.mxu0 }
 0x425   : > { %v3460_v21 = vadd.f32 %v3459_v25, %v3419_v24  ;;  %v3500_v34 = vpop.f32.mrf.mxu1 }
 0x426   : > { %v3461_v49 = vpop.f32.mrf.mxu0 }
 0x427   : > { %v3501_v41 = vadd.f32 %v3500_v34, %v3460_v21  ;;  %v3462_v42 = vadd.f32 %v3461_v49, %v3421_v48  ;;  %v3502_v50 = vpop.f32.mrf.mxu1 }
 0x428   : > { %v3463_v45 = vpop.f32.mrf.mxu0 }
 0x429   : > { %v3503_v46 = vadd.f32 %v3502_v50, %v3462_v42  ;;  %v3504_v51 = vpop.f32.mrf.mxu1  ;;  %v3509_v0 = vmax.f32 %v3501_v41, 0.0 }
 0x42a   : > { %v3464_v27 = vpop.f32.mrf.mxu0 }
 0x42b   : > { %v3510_v52 = vmax.f32 %v3503_v46, 0.0  ;;  %v3505_v13 = vpop.f32.mrf.mxu1  ;;  %v3513_v44 = vpack.c.bf16 %v3509_v0, %v3509_v0 }
 0x42d   : > { %v3514_v54 = vpack.c.bf16 %v3510_v52, %v3510_v52 }
 0x42f   : > { %3984 = vmatprep.mubr.bf16.mxu1 %v3514_v54 }
 0x430   : > { %3985 = vmatmul.mubr.bf16.vlgmr.msra.gmra.mxu1 %v3513_v44 }
 0x470   : > { %v3945_v22 = vpop.f32.mrf.mxu0 }
 0x471   : > { %v3946_v40 = vadd.f32 %v3945_v22, %v3904_v60 }
 0x472   : > { %v3947_v55 = vpop.f32.mrf.mxu0 }
 0x473   : > { %v3948_v62 = vadd.f32 %v3947_v55, %v3908_v61 }
 0x474   : > { %v3949_v15 = vpop.f32.mrf.mxu0 }
 0x476   : > { %v3950_v39 = vpop.f32.mrf.mxu0 }
 0x4f0   : > { %v3986_v9 = vpop.f32.mrf.mxu1 }
 0x4f1   : > { %v3987_v63 = vadd.f32 %v3986_v9, %v3946_v40 }
 0x4f2   : > { %v3988_v10 = vpop.f32.mrf.mxu1 }
 0x4f3   : > { %v3989_v16 = vadd.f32 %v3988_v10, %v3948_v62  ;;  %v3993_v35 = vmax.f32 %v3987_v63, 0.0 }
 0x4f4   : > { %v3990_v2 = vpop.f32.mrf.mxu1 }
 0x4f5   : > { %v3994_v4 = vmax.f32 %v3989_v16, 0.0  ;;  %v3995_v36 = vpack.c.bf16 %v3993_v35, %v3993_v35 }
 0x4f6   : > { %v3991_v5 = vpop.f32.mrf.mxu1 }
 0x4f7   : > { %v3996_v6 = vpack.c.bf16 %v3994_v4, %v3994_v4 }
 0x4f9   : > { %4158 = vmatprep.mubr.bf16.mxu0 %v3996_v6 }
 0x4fa   : > { %4159 = vmatmul.mubr.bf16.vlgmr.msra.gmra.mxu0 %v3995_v36 }
 0x5ba   : > { %v4686_v7 = vpop.f32.mrf.mxu0 }
 0x5bc   : > { %v4687_v43 = vpop.f32.mrf.mxu0 }
 0x5bd   : > { %v4688_v8 = vadd.f32 %v4687_v43, %v4686_v7 }
 0x5be   : > { %v4689_v17 = vpop.f32.mrf.mxu0 }
 0x5bf   : > { %v4161_v3 = vadd.f32 %v4688_v8, %v4029_v26 }
 0x5c0   : > { %v4690_v11 = vpop.f32.mrf.mxu0 }
 0x5c1   : > { %4167 = vst.msk [vmem:[%s464_s21] sm:$0x1] %vm4166_vm4, %v4161_v3 }
 0x5c2 PF: > { %s23_s27 = sadd.s32 1, %s5270_s27   ;;  %s6835_s25 = smov %s5266_s26 }
 0x5c3   : > { %p20_p5 = scmp.ge.s32.totalorder %s23_s27, 4   ;;  %s6836_s26 = smov %s6838_s28 }
 0x5c5   :  { %22 = sbr.rel (!%p20_p5) target bundleno = 2 (0x2), region = 110 }

</bundles_post_ra>
